<compile_context>
chip_gen: v7x
topology: tpu7x:2x2x1
jax: 0.10.0
libtpu: 0.0.40
codegen_flags: <defaults>
</compile_context>

<pallas_src>
import functools

import jax
import jax.numpy as jnp
from jax.experimental import pallas as pl
from jax.experimental.pallas import tpu as pltpu


def _round_up(x, m):
    return (x + m - 1) // m * m


# ----------------------------------------------------------------------------
# Kernel: one (batch, hw_tile) block per grid step.  All weights are pre-folded
# (Conv 1x1 no-bias + BatchNorm eval -> single (Cin, Cout) bf16 weight + f32 bias).
# ----------------------------------------------------------------------------
def _oab_kernel(x_ref, p_ref,
                wp1_ref, bp1_ref, wp2_ref, bp2_ref,   # f_pixel  (Kc^-0.5 folded in layer 2)
                wo1_ref, bo1_ref, wo2_ref, bo2_ref,   # f_object
                wd_ref, bd_ref,                       # f_down
                wu_ref, bu_ref,                       # f_up
                o_ref, *, m_actual):
    x = x_ref[0]              # (TILE_HW, Cp)  bf16
    p = p_ref[0]              # (Mp, Cp)       bf16

    def lin_relu(t_bf16, w_ref, b_ref):
        # bf16 x bf16 -> f32 accumulate on MXU, bias + relu in f32 on VPU.
        y = jnp.dot(t_bf16, w_ref[...], preferred_element_type=jnp.float32)
        y = y + b_ref[...]
        return jnp.maximum(y, 0.0)

    bf16 = lambda t: t.astype(jnp.bfloat16)

    # f_pixel(x) -> query (TILE_HW, KCp); attention scale is already in wp2/bp2.
    query = lin_relu(bf16(lin_relu(x, wp1_ref, bp1_ref)), wp2_ref, bp2_ref)
    # f_object(proxy) -> key (Mp, KCp);  f_down(proxy) -> value (Mp, KCp).
    key = lin_relu(bf16(lin_relu(p, wo1_ref, bo1_ref)), wo2_ref, bo2_ref)
    value = lin_relu(p, wd_ref, bd_ref)

    # sim = query @ key^T : contract the KC axis of both (no materialized transpose).
    sim = jax.lax.dot_general(
        bf16(query), bf16(key), (((1,), (1,)), ((), ())),
        preferred_element_type=jnp.float32)            # (TILE_HW, Mp)

    # Mask the zero-padded object columns so they vanish from the softmax.
    mp = sim.shape[-1]
    if m_actual < mp:
        col = jax.lax.broadcasted_iota(jnp.int32, sim.shape, 1)
        sim = jnp.where(col < m_actual, sim, jnp.float32(-1e30))

    # Softmax in f32 (v5e has no bf16 VPU/EUP); denominator via approx reciprocal (EUP).
    sim = sim - jnp.max(sim, axis=-1, keepdims=True)
    e = jnp.exp(sim)
    denom = jnp.sum(e, axis=-1, keepdims=True)
    attn = e * pl.reciprocal(denom, approx=True)       # (TILE_HW, Mp)

    # context = attn @ value, then f_up.
    context = jnp.dot(bf16(attn), bf16(value),
                      preferred_element_type=jnp.float32)
    out = lin_relu(bf16(context), wu_ref, bu_ref)      # (TILE_HW, Cp) f32
    o_ref[0] = out.astype(o_ref.dtype)                 # bf16, lane-dense store


# ----------------------------------------------------------------------------
# Wrapper
# ----------------------------------------------------------------------------
def object_attention_block(x_nchw, proxy_nchw, params, *, key_channels,
                           tile_hw=512):
    """x_nchw: (N, C, H, W), proxy_nchw: (N, C, Hp, Wp).  Returns (N, C, H, W) bf16."""
    n, c, h, w = x_nchw.shape
    _, cpx, hp, wp_ = proxy_nchw.shape
    assert cpx == c
    # NOTE: in this (old) module f_up is Conv2d(in_channels -> in_channels) but is fed
    # the key_channels-wide context, so it only type-checks when key_channels == in_channels.
    assert key_channels == c, "f_up requires key_channels == in_channels"

    hw = h * w
    m = hp * wp_
    kc = key_channels

    # Lane-dense padded dims.
    cp = _round_up(c, 128)
    kcp = _round_up(kc, 128)
    mp = _round_up(m, 128)
    tile_hw = _round_up(min(tile_hw, hw), 8)
    hw_pad = _round_up(hw, tile_hw)
    n_hw_tiles = hw_pad // tile_hw

    # NCHW -> token-major bf16 + zero padding.
    # TODO(synk): a channel-major kernel variant would avoid these transposes entirely;
    # here we rely on XLA fusing them with adjacent producers/consumers.
    x_tok = jnp.transpose(x_nchw.reshape(n, c, hw), (0, 2, 1)).astype(jnp.bfloat16)
    x_tok = jnp.pad(x_tok, ((0, 0), (0, hw_pad - hw), (0, cp - c)))
    p_tok = jnp.transpose(proxy_nchw.reshape(n, c, m), (0, 2, 1)).astype(jnp.bfloat16)
    p_tok = jnp.pad(p_tok, ((0, 0), (0, mp - m), (0, cp - c)))

    (wp1, bp1, wp2, bp2, wo1, bo1, wo2, bo2, wd, bd, wu, bu) = params

    # Fold the Kc^-0.5 attention scale into the last f_pixel layer (relu(s*z) = s*relu(z), s>0).
    s = jnp.float32(kc) ** jnp.float32(-0.5)
    wp2 = wp2 * s
    bp2 = bp2 * s

    def pad_w(wt, rows, cols):        # weights -> bf16, zero padded
        return jnp.pad(wt, ((0, rows - wt.shape[0]),
                            (0, cols - wt.shape[1]))).astype(jnp.bfloat16)

    def pad_b(bt, cols):              # biases stay f32 (tiny; added in f32)
        return jnp.pad(bt, ((0, 0), (0, cols - bt.shape[1]))).astype(jnp.float32)

    weights = (
        pad_w(wp1, cp, kcp), pad_b(bp1, kcp),
        pad_w(wp2, kcp, kcp), pad_b(bp2, kcp),
        pad_w(wo1, cp, kcp), pad_b(bo1, kcp),
        pad_w(wo2, kcp, kcp), pad_b(bo2, kcp),
        pad_w(wd, cp, kcp), pad_b(bd, kcp),
        pad_w(wu, kcp, cp), pad_b(bu, cp),
    )

    def full_spec(shape):
        return pl.BlockSpec(shape, lambda b, t: (0,) * len(shape))

    grid_spec = pltpu.PrefetchScalarGridSpec(
        num_scalar_prefetch=0,
        grid=(n, n_hw_tiles),
        in_specs=[
            pl.BlockSpec((1, tile_hw, cp), lambda b, t: (b, t, 0)),   # x tokens (tiled)
            pl.BlockSpec((1, mp, cp), lambda b, t: (b, 0, 0)),        # proxy tokens
            # Folded weights / biases, resident every step.
            # TODO(synk): pipeline_mode=pl.Buffered(1) on these would save ~half the
            # weight VMEM (they are constant-index), left default for portability.
            *[full_spec(wgt.shape) for wgt in weights],
        ],
        out_specs=pl.BlockSpec((1, tile_hw, cp), lambda b, t: (b, t, 0)),
    )

    # Advisory cost estimate for XLA's scheduler (MACs*2, padded dims).
    flops = 2 * n * (
        hw_pad * (cp * kcp + kcp * kcp)                              # f_pixel
        + n_hw_tiles * mp * (cp * kcp + kcp * kcp + cp * kcp)        # f_object + f_down (per tile)
        + hw_pad * mp * kcp * 2                                      # sim + context
        + hw_pad * kcp * cp                                          # f_up
    )
    transcendentals = n * hw_pad * mp
    weight_bytes = sum(int(wgt.size) * wgt.dtype.itemsize for wgt in weights)
    bytes_accessed = ((int(x_tok.size) + int(p_tok.size)) * 2
                      + weight_bytes + n * hw_pad * cp * 2)

    # VMEM budget: double-buffered x/out/proxy tiles + weights + f32 intermediates.
    io_bytes = 2 * (2 * tile_hw * cp * 2 + mp * cp * 2)
    interm_bytes = 4 * (3 * tile_hw * kcp + 2 * tile_hw * mp + 2 * mp * kcp)
    vmem_limit = int(min(max(2 * (io_bytes + 2 * weight_bytes + interm_bytes),
                             16 << 20), 64 << 20))

    out_tok = pl.pallas_call(
        functools.partial(_oab_kernel, m_actual=m),
        out_shape=jax.ShapeDtypeStruct((n, hw_pad, cp), jnp.bfloat16),
        grid_spec=grid_spec,
        compiler_params=pltpu.CompilerParams(
            dimension_semantics=("parallel", "parallel"),
            vmem_limit_bytes=vmem_limit),
        cost_estimate=pl.CostEstimate(
            flops=int(flops),
            transcendentals=int(transcendentals),
            bytes_accessed=int(bytes_accessed)),
    )(x_tok, p_tok, *weights)

    # tokens -> NCHW (drop padding)
    out_tok = out_tok[:, :hw, :c]
    return jnp.transpose(out_tok, (0, 2, 1)).reshape(n, c, h, w)


# ----------------------------------------------------------------------------
# Parameter construction: Conv2d 1x1 (no bias) + BatchNorm2d (eval) folded to
# a single (Cin, Cout) weight + (1, Cout) bias.
# ----------------------------------------------------------------------------
def _fold_conv_bn(key, cin, cout, eps=1e-5):
    k1, k2, k3, k4, k5 = jax.random.split(key, 5)
    w = jax.random.normal(k1, (cout, cin), jnp.float32) * 0.1   # conv weight (out, in)
    gamma = 1.0 + 0.1 * jax.random.normal(k2, (cout,), jnp.float32)
    beta = 0.1 * jax.random.normal(k3, (cout,), jnp.float32)
    mean = 0.1 * jax.random.normal(k4, (cout,), jnp.float32)
    var = jnp.abs(jax.random.normal(k5, (cout,), jnp.float32)) + 0.5
    s = gamma / jnp.sqrt(var + eps)
    w_eff = (w * s[:, None]).T                                   # (cin, cout)
    b_eff = (beta - mean * s).reshape(1, cout)                   # (1, cout)
    return w_eff, b_eff


def make_params(key, in_channels, key_channels):
    ks = jax.random.split(key, 6)
    wp1, bp1 = _fold_conv_bn(ks[0], in_channels, key_channels)
    wp2, bp2 = _fold_conv_bn(ks[1], key_channels, key_channels)
    wo1, bo1 = _fold_conv_bn(ks[2], in_channels, key_channels)
    wo2, bo2 = _fold_conv_bn(ks[3], key_channels, key_channels)
    wd, bd = _fold_conv_bn(ks[4], in_channels, key_channels)
    # f_up is Conv2d(in_channels -> in_channels) in the original module.
    wu, bu = _fold_conv_bn(ks[5], in_channels, in_channels)
    return (wp1, bp1, wp2, bp2, wo1, bo1, wo2, bo2, wd, bd, wu, bu)


# ----------------------------------------------------------------------------
# Pure-JAX reference mirroring the kernel's bf16 cast points (for validation).
# ----------------------------------------------------------------------------
def reference(x_nchw, proxy_nchw, params, key_channels):
    n, c, h, w = x_nchw.shape
    m = proxy_nchw.shape[2] * proxy_nchw.shape[3]
    x_tok = jnp.transpose(x_nchw.reshape(n, c, h * w), (0, 2, 1))
    p_tok = jnp.transpose(proxy_nchw.reshape(n, c, m), (0, 2, 1))
    (wp1, bp1, wp2, bp2, wo1, bo1, wo2, bo2, wd, bd, wu, bu) = params
    s = jnp.float32(key_channels) ** jnp.float32(-0.5)
    wp2, bp2 = wp2 * s, bp2 * s           # same scale fold as the kernel path
    bf = lambda t: t.astype(jnp.bfloat16)

    def lr(t, wt, bt):
        y = jnp.einsum("bij,jk->bik", bf(t), bf(wt),
                       preferred_element_type=jnp.float32) + bt
        return jnp.maximum(y, 0.0)

    query = lr(lr(x_tok, wp1, bp1), wp2, bp2)
    key = lr(lr(p_tok, wo1, bo1), wo2, bo2)
    value = lr(p_tok, wd, bd)
    sim = jnp.einsum("bqk,bmk->bqm", bf(query), bf(key),
                     preferred_element_type=jnp.float32)
    attn = jax.nn.softmax(sim, axis=-1)
    ctx = jnp.einsum("bqm,bmk->bqk", bf(attn), bf(value),
                     preferred_element_type=jnp.float32)
    out = lr(ctx, wu, bu)
    return jnp.transpose(out, (0, 2, 1)).reshape(n, c, h, w)


if __name__ == "__main__":
    N, C, H, W = 2, 32, 16, 16        # in_channels = 32
    KC = 32                           # key_channels == in_channels (required by f_up)
    M_H, M_W = 8, 1                   # proxy: 8 object regions

    root = jax.random.PRNGKey(0)
    kx, kp, kw = jax.random.split(root, 3)
    x = jax.random.normal(kx, (N, C, H, W), jnp.float32)
    proxy = jax.random.normal(kp, (N, C, M_H, M_W), jnp.float32)
    params = make_params(kw, C, KC)

    # tile_hw=128 exercises the HW tiling (grid = (2 batches, 2 HW tiles)).
    run = jax.jit(functools.partial(object_attention_block,
                                    key_channels=KC, tile_hw=128))
    out = jax.block_until_ready(run(x, proxy, params))

    ref = reference(x, proxy, params, KC)
    assert out.shape == (N, C, H, W)
    out_f32 = out.astype(jnp.float32)
    max_err = float(jnp.max(jnp.abs(out_f32 - ref)))
    assert jnp.allclose(out_f32, ref, atol=3e-2, rtol=3e-2), (
        f"mismatch vs reference, max abs err {max_err}")
    print("KERNEL_OK")
</pallas_src>

<mosaic_0001>
module attributes {stable_mosaic.version = 11 : i64} {
  func.func @_oab_kernel(%arg0: i32, %arg1: i32, %arg2: memref<1x128x128xbf16, #tpu.memory_space<vmem>>, %arg3: memref<1x128x128xbf16, #tpu.memory_space<vmem>>, %arg4: memref<128x128xbf16, #tpu.memory_space<vmem>>, %arg5: memref<1x128xf32, #tpu.memory_space<vmem>>, %arg6: memref<128x128xbf16, #tpu.memory_space<vmem>>, %arg7: memref<1x128xf32, #tpu.memory_space<vmem>>, %arg8: memref<128x128xbf16, #tpu.memory_space<vmem>>, %arg9: memref<1x128xf32, #tpu.memory_space<vmem>>, %arg10: memref<128x128xbf16, #tpu.memory_space<vmem>>, %arg11: memref<1x128xf32, #tpu.memory_space<vmem>>, %arg12: memref<128x128xbf16, #tpu.memory_space<vmem>>, %arg13: memref<1x128xf32, #tpu.memory_space<vmem>>, %arg14: memref<128x128xbf16, #tpu.memory_space<vmem>>, %arg15: memref<1x128xf32, #tpu.memory_space<vmem>>, %arg16: memref<1x128x128xbf16, #tpu.memory_space<vmem>>) attributes {dimension_semantics = [#tpu.dimension_semantics<parallel>, #tpu.dimension_semantics<parallel>], iteration_bounds = array<i64: 2, 2>, scalar_prefetch = 0 : i64, scratch_operands = 0 : i64, tpu.core_type = #tpu.core_type<tc>, window_params = [{transform_indices = @transform_0, window_bounds = array<i64: 1, 128, 128>}, {transform_indices = @transform_1, window_bounds = array<i64: 1, 128, 128>}, {pipeline_mode = #tpu.pipeline_mode<synchronous>, transform_indices = @transform_2, window_bounds = array<i64: 128, 128>}, {pipeline_mode = #tpu.pipeline_mode<synchronous>, transform_indices = @transform_3, window_bounds = array<i64: 1, 128>}, {pipeline_mode = #tpu.pipeline_mode<synchronous>, transform_indices = @transform_4, window_bounds = array<i64: 128, 128>}, {pipeline_mode = #tpu.pipeline_mode<synchronous>, transform_indices = @transform_5, window_bounds = array<i64: 1, 128>}, {pipeline_mode = #tpu.pipeline_mode<synchronous>, transform_indices = @transform_6, window_bounds = array<i64: 128, 128>}, {pipeline_mode = #tpu.pipeline_mode<synchronous>, transform_indices = @transform_7, window_bounds = array<i64: 1, 128>}, {pipeline_mode = #tpu.pipeline_mode<synchronous>, transform_indices = @transform_8, window_bounds = array<i64: 128, 128>}, {pipeline_mode = #tpu.pipeline_mode<synchronous>, transform_indices = @transform_9, window_bounds = array<i64: 1, 128>}, {pipeline_mode = #tpu.pipeline_mode<synchronous>, transform_indices = @transform_10, window_bounds = array<i64: 128, 128>}, {pipeline_mode = #tpu.pipeline_mode<synchronous>, transform_indices = @transform_11, window_bounds = array<i64: 1, 128>}, {pipeline_mode = #tpu.pipeline_mode<synchronous>, transform_indices = @transform_12, window_bounds = array<i64: 128, 128>}, {pipeline_mode = #tpu.pipeline_mode<synchronous>, transform_indices = @transform_13, window_bounds = array<i64: 1, 128>}, {transform_indices = @transform_14, window_bounds = array<i64: 1, 128, 128>}]} {
    %c0 = arith.constant 0 : index
    %c0_0 = arith.constant 0 : index
    %c0_1 = arith.constant 0 : index
    %0 = vector.load %arg2[%c0, %c0_0, %c0_1] : memref<1x128x128xbf16, #tpu.memory_space<vmem>>, vector<1x128x128xbf16>
    %1 = vector.shape_cast %0 : vector<1x128x128xbf16> to vector<128x128xbf16>
    %c0_2 = arith.constant 0 : index
    %c0_3 = arith.constant 0 : index
    %c0_4 = arith.constant 0 : index
    %2 = vector.load %arg3[%c0_2, %c0_3, %c0_4] : memref<1x128x128xbf16, #tpu.memory_space<vmem>>, vector<1x128x128xbf16>
    %3 = vector.shape_cast %2 : vector<1x128x128xbf16> to vector<128x128xbf16>
    %c0_5 = arith.constant 0 : index
    %c0_6 = arith.constant 0 : index
    %4 = vector.load %arg4[%c0_5, %c0_6] : memref<128x128xbf16, #tpu.memory_space<vmem>>, vector<128x128xbf16>
    %cst = arith.constant dense<0.000000e+00> : vector<128x128xf32>
    %5 = tpu.matmul %1, %4, %cst {dimension_numbers = #tpu.dot_dimension_numbers<[1], [0], [0], [1], [0, 0, 1, 1], [], []>} : vector<128x128xbf16>, vector<128x128xbf16>, vector<128x128xf32> -> vector<128x128xf32>
    %c0_7 = arith.constant 0 : index
    %c0_8 = arith.constant 0 : index
    %6 = vector.load %arg5[%c0_7, %c0_8] : memref<1x128xf32, #tpu.memory_space<vmem>>, vector<1x128xf32>
    %7 = vector.broadcast %6 : vector<1x128xf32> to vector<128x128xf32>
    %8 = arith.addf %5, %7 : vector<128x128xf32>
    %cst_9 = arith.constant 0.000000e+00 : f32
    %9 = vector.broadcast %cst_9 : f32 to vector<128x128xf32>
    %10 = arith.maximumf %8, %9 : vector<128x128xf32>
    %11 = arith.truncf %10 : vector<128x128xf32> to vector<128x128xbf16>
    %c0_10 = arith.constant 0 : index
    %c0_11 = arith.constant 0 : index
    %12 = vector.load %arg6[%c0_10, %c0_11] : memref<128x128xbf16, #tpu.memory_space<vmem>>, vector<128x128xbf16>
    %cst_12 = arith.constant dense<0.000000e+00> : vector<128x128xf32>
    %13 = tpu.matmul %11, %12, %cst_12 {dimension_numbers = #tpu.dot_dimension_numbers<[1], [0], [0], [1], [0, 0, 1, 1], [], []>} : vector<128x128xbf16>, vector<128x128xbf16>, vector<128x128xf32> -> vector<128x128xf32>
    %c0_13 = arith.constant 0 : index
    %c0_14 = arith.constant 0 : index
    %14 = vector.load %arg7[%c0_13, %c0_14] : memref<1x128xf32, #tpu.memory_space<vmem>>, vector<1x128xf32>
    %15 = vector.broadcast %14 : vector<1x128xf32> to vector<128x128xf32>
    %16 = arith.addf %13, %15 : vector<128x128xf32>
    %cst_15 = arith.constant 0.000000e+00 : f32
    %17 = vector.broadcast %cst_15 : f32 to vector<128x128xf32>
    %18 = arith.maximumf %16, %17 : vector<128x128xf32>
    %c0_16 = arith.constant 0 : index
    %c0_17 = arith.constant 0 : index
    %19 = vector.load %arg8[%c0_16, %c0_17] : memref<128x128xbf16, #tpu.memory_space<vmem>>, vector<128x128xbf16>
    %cst_18 = arith.constant dense<0.000000e+00> : vector<128x128xf32>
    %20 = tpu.matmul %3, %19, %cst_18 {dimension_numbers = #tpu.dot_dimension_numbers<[1], [0], [0], [1], [0, 0, 1, 1], [], []>} : vector<128x128xbf16>, vector<128x128xbf16>, vector<128x128xf32> -> vector<128x128xf32>
    %c0_19 = arith.constant 0 : index
    %c0_20 = arith.constant 0 : index
    %21 = vector.load %arg9[%c0_19, %c0_20] : memref<1x128xf32, #tpu.memory_space<vmem>>, vector<1x128xf32>
    %22 = vector.broadcast %21 : vector<1x128xf32> to vector<128x128xf32>
    %23 = arith.addf %20, %22 : vector<128x128xf32>
    %cst_21 = arith.constant 0.000000e+00 : f32
    %24 = vector.broadcast %cst_21 : f32 to vector<128x128xf32>
    %25 = arith.maximumf %23, %24 : vector<128x128xf32>
    %26 = arith.truncf %25 : vector<128x128xf32> to vector<128x128xbf16>
    %c0_22 = arith.constant 0 : index
    %c0_23 = arith.constant 0 : index
    %27 = vector.load %arg10[%c0_22, %c0_23] : memref<128x128xbf16, #tpu.memory_space<vmem>>, vector<128x128xbf16>
    %cst_24 = arith.constant dense<0.000000e+00> : vector<128x128xf32>
    %28 = tpu.matmul %26, %27, %cst_24 {dimension_numbers = #tpu.dot_dimension_numbers<[1], [0], [0], [1], [0, 0, 1, 1], [], []>} : vector<128x128xbf16>, vector<128x128xbf16>, vector<128x128xf32> -> vector<128x128xf32>
    %c0_25 = arith.constant 0 : index
    %c0_26 = arith.constant 0 : index
    %29 = vector.load %arg11[%c0_25, %c0_26] : memref<1x128xf32, #tpu.memory_space<vmem>>, vector<1x128xf32>
    %30 = vector.broadcast %29 : vector<1x128xf32> to vector<128x128xf32>
    %31 = arith.addf %28, %30 : vector<128x128xf32>
    %cst_27 = arith.constant 0.000000e+00 : f32
    %32 = vector.broadcast %cst_27 : f32 to vector<128x128xf32>
    %33 = arith.maximumf %31, %32 : vector<128x128xf32>
    %c0_28 = arith.constant 0 : index
    %c0_29 = arith.constant 0 : index
    %34 = vector.load %arg12[%c0_28, %c0_29] : memref<128x128xbf16, #tpu.memory_space<vmem>>, vector<128x128xbf16>
    %cst_30 = arith.constant dense<0.000000e+00> : vector<128x128xf32>
    %35 = tpu.matmul %3, %34, %cst_30 {dimension_numbers = #tpu.dot_dimension_numbers<[1], [0], [0], [1], [0, 0, 1, 1], [], []>} : vector<128x128xbf16>, vector<128x128xbf16>, vector<128x128xf32> -> vector<128x128xf32>
    %c0_31 = arith.constant 0 : index
    %c0_32 = arith.constant 0 : index
    %36 = vector.load %arg13[%c0_31, %c0_32] : memref<1x128xf32, #tpu.memory_space<vmem>>, vector<1x128xf32>
    %37 = vector.broadcast %36 : vector<1x128xf32> to vector<128x128xf32>
    %38 = arith.addf %35, %37 : vector<128x128xf32>
    %cst_33 = arith.constant 0.000000e+00 : f32
    %39 = vector.broadcast %cst_33 : f32 to vector<128x128xf32>
    %40 = arith.maximumf %38, %39 : vector<128x128xf32>
    %41 = arith.truncf %18 : vector<128x128xf32> to vector<128x128xbf16>
    %42 = arith.truncf %33 : vector<128x128xf32> to vector<128x128xbf16>
    %cst_34 = arith.constant dense<0.000000e+00> : vector<128x128xf32>
    %43 = tpu.matmul %41, %42, %cst_34 {dimension_numbers = #tpu.dot_dimension_numbers<[1], [1], [0], [0], [0, 0, 1, 0], [], []>} : vector<128x128xbf16>, vector<128x128xbf16>, vector<128x128xf32> -> vector<128x128xf32>
    %44 = tpu.iota {dimensions = array<i32: 1>} : vector<128x128xi32>
    %c8_i32 = arith.constant 8 : i32
    %45 = vector.broadcast %c8_i32 : i32 to vector<128x128xi32>
    %46 = arith.cmpi slt, %44, %45 : vector<128x128xi32>
    %cst_35 = arith.constant -1.000000e+30 : f32
    %47 = vector.broadcast %cst_35 : f32 to vector<128x128xf32>
    %48 = arith.select %46, %43, %47 : vector<128x128xi1>, vector<128x128xf32>
    %cst_36 = arith.constant dense<0xFF800000> : vector<128xf32>
    %49 = vector.multi_reduction <maximumf>, %48, %cst_36 [1] : vector<128x128xf32> to vector<128xf32>
    %50 = vector.shape_cast %49 : vector<128xf32> to vector<128x1xf32>
    %51 = vector.broadcast %50 : vector<128x1xf32> to vector<128x128xf32>
    %52 = arith.subf %48, %51 : vector<128x128xf32>
    %53 = math.exp %52 : vector<128x128xf32>
    %cst_37 = arith.constant dense<0.000000e+00> : vector<128xf32>
    %54 = vector.multi_reduction <add>, %53, %cst_37 [1] : vector<128x128xf32> to vector<128xf32>
    %55 = vector.shape_cast %54 : vector<128xf32> to vector<128x1xf32>
    %56 = tpu.reciprocal %55 {approx = true} : vector<128x1xf32> -> vector<128x1xf32>
    %57 = vector.broadcast %56 : vector<128x1xf32> to vector<128x128xf32>
    %58 = arith.mulf %53, %57 : vector<128x128xf32>
    %59 = arith.truncf %58 : vector<128x128xf32> to vector<128x128xbf16>
    %60 = arith.truncf %40 : vector<128x128xf32> to vector<128x128xbf16>
    %cst_38 = arith.constant dense<0.000000e+00> : vector<128x128xf32>
    %61 = tpu.matmul %59, %60, %cst_38 {dimension_numbers = #tpu.dot_dimension_numbers<[1], [0], [0], [1], [0, 0, 1, 1], [], []>} : vector<128x128xbf16>, vector<128x128xbf16>, vector<128x128xf32> -> vector<128x128xf32>
    %62 = arith.truncf %61 : vector<128x128xf32> to vector<128x128xbf16>
    %c0_39 = arith.constant 0 : index
    %c0_40 = arith.constant 0 : index
    %63 = vector.load %arg14[%c0_39, %c0_40] : memref<128x128xbf16, #tpu.memory_space<vmem>>, vector<128x128xbf16>
    %cst_41 = arith.constant dense<0.000000e+00> : vector<128x128xf32>
    %64 = tpu.matmul %62, %63, %cst_41 {dimension_numbers = #tpu.dot_dimension_numbers<[1], [0], [0], [1], [0, 0, 1, 1], [], []>} : vector<128x128xbf16>, vector<128x128xbf16>, vector<128x128xf32> -> vector<128x128xf32>
    %c0_42 = arith.constant 0 : index
    %c0_43 = arith.constant 0 : index
    %65 = vector.load %arg15[%c0_42, %c0_43] : memref<1x128xf32, #tpu.memory_space<vmem>>, vector<1x128xf32>
    %66 = vector.broadcast %65 : vector<1x128xf32> to vector<128x128xf32>
    %67 = arith.addf %64, %66 : vector<128x128xf32>
    %cst_44 = arith.constant 0.000000e+00 : f32
    %68 = vector.broadcast %cst_44 : f32 to vector<128x128xf32>
    %69 = arith.maximumf %67, %68 : vector<128x128xf32>
    %70 = arith.truncf %69 : vector<128x128xf32> to vector<128x128xbf16>
    %c0_45 = arith.constant 0 : index
    %c0_46 = arith.constant 0 : index
    %c0_47 = arith.constant 0 : index
    %71 = vector.load %arg16[%c0_45, %c0_46, %c0_47] : memref<1x128x128xbf16, #tpu.memory_space<vmem>>, vector<1x128x128xbf16>
    %72 = vector.shape_cast %71 : vector<1x128x128xbf16> to vector<128x128xbf16>
    %73 = vector.shape_cast %70 : vector<128x128xbf16> to vector<1x128x128xbf16>
    tpu.vector_store %arg16[%c0_45, %c0_46, %c0_47], %73 {strides = array<i32>} : memref<1x128x128xbf16, #tpu.memory_space<vmem>>, vector<1x128x128xbf16>,
    return
  }
  func.func @transform_0(%arg0: i32, %arg1: i32) -> (i32, i32, i32) {
    %c0_i32 = arith.constant 0 : i32
    %c0_i32_0 = arith.constant 0 : i32
    return %arg0, %arg1, %c0_i32 : i32, i32, i32
  }
  func.func @transform_1(%arg0: i32, %arg1: i32) -> (i32, i32, i32) {
    %c0_i32 = arith.constant 0 : i32
    %c0_i32_0 = arith.constant 0 : i32
    %c0_i32_1 = arith.constant 0 : i32
    return %arg0, %c0_i32, %c0_i32_0 : i32, i32, i32
  }
  func.func @transform_2(%arg0: i32, %arg1: i32) -> (i32, i32) {
    %c0_i32 = arith.constant 0 : i32
    %c0_i32_0 = arith.constant 0 : i32
    %c0_i32_1 = arith.constant 0 : i32
    return %c0_i32, %c0_i32_0 : i32, i32
  }
  func.func @transform_3(%arg0: i32, %arg1: i32) -> (i32, i32) {
    %c0_i32 = arith.constant 0 : i32
    %c0_i32_0 = arith.constant 0 : i32
    %c0_i32_1 = arith.constant 0 : i32
    return %c0_i32, %c0_i32_0 : i32, i32
  }
  func.func @transform_4(%arg0: i32, %arg1: i32) -> (i32, i32) {
    %c0_i32 = arith.constant 0 : i32
    %c0_i32_0 = arith.constant 0 : i32
    %c0_i32_1 = arith.constant 0 : i32
    return %c0_i32, %c0_i32_0 : i32, i32
  }
  func.func @transform_5(%arg0: i32, %arg1: i32) -> (i32, i32) {
    %c0_i32 = arith.constant 0 : i32
    %c0_i32_0 = arith.constant 0 : i32
    %c0_i32_1 = arith.constant 0 : i32
    return %c0_i32, %c0_i32_0 : i32, i32
  }
  func.func @transform_6(%arg0: i32, %arg1: i32) -> (i32, i32) {
    %c0_i32 = arith.constant 0 : i32
    %c0_i32_0 = arith.constant 0 : i32
    %c0_i32_1 = arith.constant 0 : i32
    return %c0_i32, %c0_i32_0 : i32, i32
  }
  func.func @transform_7(%arg0: i32, %arg1: i32) -> (i32, i32) {
    %c0_i32 = arith.constant 0 : i32
    %c0_i32_0 = arith.constant 0 : i32
    %c0_i32_1 = arith.constant 0 : i32
    return %c0_i32, %c0_i32_0 : i32, i32
  }
  func.func @transform_8(%arg0: i32, %arg1: i32) -> (i32, i32) {
    %c0_i32 = arith.constant 0 : i32
    %c0_i32_0 = arith.constant 0 : i32
    %c0_i32_1 = arith.constant 0 : i32
    return %c0_i32, %c0_i32_0 : i32, i32
  }
  func.func @transform_9(%arg0: i32, %arg1: i32) -> (i32, i32) {
    %c0_i32 = arith.constant 0 : i32
    %c0_i32_0 = arith.constant 0 : i32
    %c0_i32_1 = arith.constant 0 : i32
    return %c0_i32, %c0_i32_0 : i32, i32
  }
  func.func @transform_10(%arg0: i32, %arg1: i32) -> (i32, i32) {
    %c0_i32 = arith.constant 0 : i32
    %c0_i32_0 = arith.constant 0 : i32
    %c0_i32_1 = arith.constant 0 : i32
    return %c0_i32, %c0_i32_0 : i32, i32
  }
  func.func @transform_11(%arg0: i32, %arg1: i32) -> (i32, i32) {
    %c0_i32 = arith.constant 0 : i32
    %c0_i32_0 = arith.constant 0 : i32
    %c0_i32_1 = arith.constant 0 : i32
    return %c0_i32, %c0_i32_0 : i32, i32
  }
  func.func @transform_12(%arg0: i32, %arg1: i32) -> (i32, i32) {
    %c0_i32 = arith.constant 0 : i32
    %c0_i32_0 = arith.constant 0 : i32
    %c0_i32_1 = arith.constant 0 : i32
    return %c0_i32, %c0_i32_0 : i32, i32
  }
  func.func @transform_13(%arg0: i32, %arg1: i32) -> (i32, i32) {
    %c0_i32 = arith.constant 0 : i32
    %c0_i32_0 = arith.constant 0 : i32
    %c0_i32_1 = arith.constant 0 : i32
    return %c0_i32, %c0_i32_0 : i32, i32
  }
  func.func @transform_14(%arg0: i32, %arg1: i32) -> (i32, i32, i32) {
    %c0_i32 = arith.constant 0 : i32
    %c0_i32_0 = arith.constant 0 : i32
    return %arg0, %arg1, %c0_i32 : i32, i32, i32
  }
}

</mosaic_0001>

<bundles_post_ra>
// kernel: object_attention_block.1
= control target key start
LH: loop header
LB: loop body
LE: loop exit
PB: predicated region body
PF: predicated region fallthrough
CT: control target
= control target key end

     0   :  { %s3915_s0 = inlined_call_operand.vmem [shape: bf16[2,256,128], index: 0, kind: input, shape index: {}]   ;;  %s3916_s1 = inlined_call_operand.vmem [shape: bf16[2,128,128], index: 1, kind: input, shape index: {}]   ;;  %s3917_s2 = inlined_call_operand.vmem [shape: bf16[128,128], index: 2, kind: input, shape index: {}]   ;;  %s3918_s3 = inlined_call_operand.vmem [shape: f32[1,128], index: 3, kind: input, shape index: {}]   ;;  %s3919_s4 = inlined_call_operand.vmem [shape: bf16[128,128], index: 4, kind: input, shape index: {}]   ;;  %s3920_s5 = inlined_call_operand.vmem [shape: f32[1,128], index: 5, kind: input, shape index: {}]   ;;  %s3921_s6 = inlined_call_operand.vmem [shape: bf16[128,128], index: 6, kind: input, shape index: {}]   ;;  %s3922_s7 = inlined_call_operand.vmem [shape: f32[1,128], index: 7, kind: input, shape index: {}]   ;;  %s3923_s8 = inlined_call_operand.vmem [shape: bf16[128,128], index: 8, kind: input, shape index: {}]   ;;  %s3924_s9 = inlined_call_operand.vmem [shape: f32[1,128], index: 9, kind: input, shape index: {}]   ;;  %s3925_s10 = inlined_call_operand.vmem [shape: bf16[128,128], index: 10, kind: input, shape index: {}]   ;;  %s3926_s11 = inlined_call_operand.vmem [shape: f32[1,128], index: 11, kind: input, shape index: {}]   ;;  %s3927_s12 = inlined_call_operand.vmem [shape: bf16[128,128], index: 12, kind: input, shape index: {}]   ;;  %s3928_s13 = inlined_call_operand.vmem [shape: f32[1,128], index: 13, kind: input, shape index: {}]   ;;  %s3929_s14 = inlined_call_operand.hbm [shape: bf16[2,256,128], index: 14, kind: output, shape index: {}]  }
   0x1   :  { %3939 = sst [smem:[#allocation13_spill]] %s3929_s14 }
   0x2   :  { %19 = vsyncpa [#allocation3], 0 }
   0x3   :  { %21 = vsyncpa [#allocation3 + $0x1], 0  ;;  %s3295_s29 = smov 0   ;;  %s3297_s30 = smov 0  }
   0x4   :  { %s3299_s15 = smov 0   ;;  %s3301_s16 = smov 0  }
   0x5   :  { %s3303_s17 = smov 0   ;;  %s3305_s18 = smov 0  }
   0x6   :  { %s3307_s19 = smov 0   ;;  %s3309_s20 = smov 0  }
   0x7 LB: > { %3940 = sst [smem:[#allocation5_spill]] %s3187_s29  ;;  %s2353_s21 = sadd.s32 4294967295, %s3215_s20   ;;  %s3215_s20 = sphi %s3309_s20, %s27_s20   ;;  %s3211_s19 = sphi %s3307_s19, %s3958_s19   ;;  %s3207_s18 = sphi %s3305_s18, %s3957_s18   ;;  %s3203_s17 = sphi %s3303_s17, %s3962_s17   ;;  %s3199_s16 = sphi %s3301_s16, %s3955_s16   ;;  %s3195_s15 = sphi %s3299_s15, %s3961_s15   ;;  %s3191_s30 = sphi %s3297_s30, %s3960_s30   ;;  %s3187_s29 = sphi %s3295_s29, %s3959_s29  }
   0x8   : > { %3941 = sst [smem:[#allocation6_spill]] %s3207_s18  ;;  %s2354_s22 = sadd.s32 4294967294, %s3215_s20  }
   0x9   : > { %3942 = sst [smem:[#allocation7_spill]] %s3211_s19  ;;  %s36_s23 = sadd.s32 1, %s3207_s18 }
   0xa   : > { %p37_p0 = scmp.ge.s32.totalorder %s36_s23, 2  ;;  %s39_s24 = sadd.s32 1, %s3211_s19 }
   0xb   : > { %p364_p1 = scmp.ne.s32.totalorder %s3195_s15, %s3191_s30  ;;  %p365_p2 = scmp.eq.s32.totalorder %s2353_s21, 3 }
   0xc   : > { %s3964_s23 = smov (%p37_p0, %s36_s23), 0  ;;  %s3966_s24 = smov (!%p37_p0, %s39_s24), %s3211_s19 }
   0xd   : > { %3943 = sst [smem:[#allocation8_spill]] %s3964_s23  ;;  %s350_s25 = ssub.s32 %s3207_s18, %s3964_s23 }
   0xe   : > { %p3346_p3 = por %p365_p2, %p364_p1  ;;  %p41_p4 = scmp.ge.s32.totalorder %s3966_s24, 2 }
   0xf   : > { %p370_p5 = scmp.ne.s32.totalorder %s3191_s30, %s3187_s29  ;;  %p371_p6 = scmp.eq.s32.totalorder %s2354_s22, 3 }
  0x10   : > { %s3944_s26 = scalar_select %p3346_p3, 1, 0 }
  0x11   : > { %p2357_p7 = scmp.ge.s32.totalorder %s3215_s20, 1  ;;  %s3968_s24 = smov (%p41_p4, %s3966_s24), 0 }
  0x12   : > { %3945 = sst [smem:[#allocation9_spill]] %s3944_s26  ;;  %p3355_p8 = por %p371_p6, %p370_p5 }
  0x13   : > { %3946 = sst [smem:[#allocation10_spill]] %s3968_s24  ;;  %p446_p9 = scmp.lt.s32.totalorder %s3215_s20, 5 }
  0x14   : > { %s3947_s27 = scalar_select %p3355_p8, 1, 0 }
  0x15   : > { %s349_s28 = ssub.s32 %s3211_s19, %s3968_s24  ;;  %s354_s21 = sadd.s32 1, %s3195_s15 }
  0x16   : > { %3948 = sst [smem:[#allocation11_spill]] %s3947_s27  ;;  %s351_s14 = sor.u32 %s350_s25, %s349_s28 }
  0x17   : > { %p447_p10 = pnand %p2357_p7, %p446_p9  ;;  %p352_p11 = scmp.eq.s32.totalorder %s351_s14, 0 }
  0x18   : > { %v2993_v0 = vld [vmem:[%s3917_s2] sm:$0xff] (!%p447_p10)   ;;  %s3370_s22 = sshll.u32 (!%p447_p10), %s3199_s16, 4  ;;  %v2994_v1 = vld [vmem:[%s3917_s2 + $0x8] sm:$0xff] (!%p447_p10)   ;;  %p502_p12 = scmp.lt.s32.totalorder (!%p447_p10), %s3203_s17, 1  ;;  %v2995_v2 = vld [vmem:[%s3917_s2 + $0x10] sm:$0xff] (!%p447_p10)  }
  0x19   : > { %s3364_s23 = scalar_select %p352_p11, %s3195_s15, %s354_s21  }
  0x1a   : > { %450 = sbr.rel (%p447_p10) target bundleno = 1611 (0x64b), region = 76  ;;  %2648 = vmatprep.subr.bf16.mxu0 (!%p447_p10), %v2993_v0  ;;  %p504_p13 = scmp.lt.s32.totalorder (!%p447_p10), %s3370_s22, 31  ;;  %v2996_v3 = vld [vmem:[%s3917_s2 + $0x18] sm:$0xff] (!%p447_p10)   ;;  %v2997_v5 = vld [vmem:[%s3917_s2 + $0x20] sm:$0xff] (!%p447_p10)   ;;  %v2998_v6 = vld [vmem:[%s3917_s2 + $0x28] sm:$0xff] (!%p447_p10)  }
  0x1b   : > { %3949 = sst [smem:[#allocation12_spill]] %s3364_s23  ;;  %2649 = vmatpush3.bf16.msra.mxu0 (!%p447_p10), %v2993_v0  ;;  %v2999_v7 = vld [vmem:[%s3917_s2 + $0x30] sm:$0xff] (!%p447_p10)   ;;  %v3000_v8 = vld [vmem:[%s3917_s2 + $0x38] sm:$0xff] (!%p447_p10)   ;;  %v3003_v9 = vld [vmem:[%s3921_s6] sm:$0xff] (!%p447_p10)   ;;  %s2452_s19 = sshll.u32 (!%p447_p10), %s3203_s17, 5 }
  0x1c   : > { %2650 = vmatprep.subr.bf16.mxu0 (!%p447_p10), %v2994_v1  ;;  %v3004_v11 = vld [vmem:[%s3921_s6 + $0x8] sm:$0xff] (!%p447_p10)   ;;  %v3025_v13 = vld [vmem:[%s3919_s4] sm:$0xff] (!%p447_p10)   ;;  %v3007_v16 = vld [vmem:[%s3921_s6 + $0x10] sm:$0xff] (!%p447_p10)   ;;  %s2256_s24 = sadd.s32 (!%p447_p10), %s2452_s19, %s3370_s22 }
  0x1d   : > { %v3026_v14 = vld [vmem:[%s3919_s4 + $0x8] sm:$0xff] (!%p447_p10)   ;;  %2680 = vmatprep.subr.bf16.mxu1 (!%p447_p10), %v3025_v13  ;;  %v3027_v18 = vld [vmem:[%s3919_s4 + $0x10] sm:$0xff] (!%p447_p10)   ;;  %v3008_v19 = vld [vmem:[%s3921_s6 + $0x18] sm:$0xff] (!%p447_p10)  }
  0x1e   : > { %2681 = vmatpush3.bf16.msra.mxu1 (!%p447_p10), %v3025_v13  ;;  %v3028_v20 = vld [vmem:[%s3919_s4 + $0x18] sm:$0xff] (!%p447_p10)   ;;  %v3011_v21 = vld [vmem:[%s3921_s6 + $0x20] sm:$0xff] (!%p447_p10)   ;;  %v3012_v25 = vld [vmem:[%s3921_s6 + $0x28] sm:$0xff] (!%p447_p10)  }
  0x1f   : > { %2651 = vmatpush3.bf16.msra.mxu0 (!%p447_p10), %v2994_v1  ;;  %2682 = vmatprep.subr.bf16.mxu1 (!%p447_p10), %v3026_v14  ;;  %v3029_v22 = vld [vmem:[%s3919_s4 + $0x20] sm:$0xff] (!%p447_p10)   ;;  %v3030_v26 = vld [vmem:[%s3919_s4 + $0x28] sm:$0xff] (!%p447_p10)   ;;  %v3015_v27 = vld [vmem:[%s3921_s6 + $0x30] sm:$0xff] (!%p447_p10)  }
  0x20   : > { %2652 = vmatprep.subr.bf16.mxu0 (!%p447_p10), %v2995_v2  ;;  %v3016_v30 = vld [vmem:[%s3921_s6 + $0x38] sm:$0xff] (!%p447_p10)   ;;  %v3031_v38 = vld [vmem:[%s3919_s4 + $0x30] sm:$0xff] (!%p447_p10)   ;;  %v3033_v40 = vld [vmem:[%s3923_s8] sm:$0xff] (!%p447_p10)  }
  0x21   : > { %s503_s14 = scalar_select %p502_p12, %s3203_s17, 1  ;;  %v3032_v39 = vld [vmem:[%s3919_s4 + $0x38] sm:$0xff]   ;;  %v3498_v41 = vld [vmem:[%s3918_s3] ss:$0 sm:$0xff]  ;;  %v3034_v59 = vld [vmem:[%s3923_s8 + $0x8] sm:$0xff]  }
  0x22   : > { %s505_s18 = scalar_select %p504_p13, %s3370_s22, 31  ;;  %2683 = vmatpush3.bf16.msra.mxu1 %v3026_v14 }
  0x23   : > { %s2360_s28 = sshll.u32 %s503_s14, 5  ;;  %2653 = vmatpush3.bf16.msra.mxu0 %v2995_v2  ;;  %2684 = vmatprep.subr.bf16.mxu1 %v3027_v18  ;;  %s3951_s22 = sld [smem:[#allocation13_spill]] }
  0x24   : > { %s507_s16 = sadd.s32 %s2360_s28, %s505_s18  ;;  %2654 = vmatprep.subr.bf16.mxu0 %v2996_v3  ;;  %s498_s28 = sand.u32 1, %s3191_s30  }
  0x25   : > { %s2361_s21 = sshll.u32 %s507_s16, 2  ;;  %s2456_s16 = sshll.u32 %s503_s14, 6 }
  0x26   : > { %s3388_s23 = scalar_lea.vmem %s3915_s0, %s2361_s21  ;;  %s3403_s27 = scalar_lea.vmem %s3916_s1, %s2456_s16  ;;  %2685 = vmatpush3.bf16.msra.mxu1 %v3027_v18 }
  0x27   : > { %v3001_v4 = vld [vmem:[%s3388_s23] sm:$0xff]   ;;  %2655 = vmatpush3.bf16.msra.mxu0 %v2996_v3  ;;  %v3002_v10 = vld [vmem:[%s3388_s23 + $0x8] sm:$0xff]   ;;  %v3005_v12 = vld [vmem:[%s3388_s23 + $0x10] sm:$0xff]   ;;  %2686 = vmatprep.subr.bf16.mxu1 %v3028_v20  ;;  %s2358_s14 = sshll.u32 %s498_s28, 6  ;;  %s2453_s21 = sshll.u32 %s2256_s24, 6 }
  0x28   : > { %2664 = vmatprep.mubr.bf16.mxu0 %v3001_v4  ;;  %2656 = vmatprep.subr.bf16.mxu0 %v2997_v5  ;;  %v3006_v15 = vld [vmem:[%s3388_s23 + $0x18] sm:$0xff]   ;;  %v3009_v17 = vld [vmem:[%s3388_s23 + $0x20] sm:$0xff]   ;;  %v3010_v23 = vld [vmem:[%s3388_s23 + $0x28] sm:$0xff]   ;;  %s3863_s29 = scalar_lea.sflag [#allocation3], %s498_s28 }
  0x29   : > { %v3013_v24 = vld [vmem:[%s3388_s23 + $0x30] sm:$0xff]   ;;  %v3014_v28 = vld [vmem:[%s3388_s23 + $0x38] sm:$0xff]   ;;  %v3017_v29 = vld [vmem:[%s3403_s27] sm:$0xff]   ;;  %s3855_s25 = scalar_lea.hbm %s3951_s22, %s2453_s21 }
  0x2a   : > { %2687 = vmatpush3.bf16.msra.mxu1 %v3028_v20  ;;  %v3459_v31 = vld [vmem:[%s3403_s27 + $0x8] sm:$0xff]   ;;  %v3462_v32 = vld [vmem:[%s3403_s27 + $0x10] sm:$0xff]   ;;  %v3467_v33 = vld [vmem:[%s3403_s27 + $0x18] sm:$0xff]  }
  0x2b   : > { %2657 = vmatpush3.bf16.msra.mxu0 %v2997_v5  ;;  %2688 = vmatprep.subr.bf16.mxu1 %v3029_v22  ;;  %v3470_v34 = vld [vmem:[%s3403_s27 + $0x20] sm:$0xff]   ;;  %v3475_v35 = vld [vmem:[%s3403_s27 + $0x28] sm:$0xff]   ;;  %v3478_v36 = vld [vmem:[%s3403_s27 + $0x30] sm:$0xff]  }
  0x2c   : > { %2658 = vmatprep.subr.bf16.mxu0 %v2998_v6  ;;  %v3483_v37 = vld [vmem:[%s3403_s27 + $0x38] sm:$0xff]   ;;  %v3035_v3 = vld [vmem:[%s3923_s8 + $0x10] sm:$0xff]   ;;  %s3841_s27 = scalar_lea.vmem [#allocation2], %s2358_s14  ;;  %s3217_s14 = smov [#allocation2]  }
  0x2d   : > { %s2259_s26 = sshll.u32 %s3841_s27, 4  ;;  %s3125_s19 = sshll.u32 %s3217_s14, 4  ;;  %s3857_s26 = int_to_ptr.vmem [resolvable:$true] %s2259_s26  ;;  %s3126_s19 = int_to_ptr.vmem [resolvable:$false] %s3125_s19 }
  0x2e   : > { %2689 = vmatpush3.bf16.msra.mxu1 %v3029_v22  ;;  %s3121_s18 = scalar_lea.vmem %s3857_s26, 1024  ;;  %s3127_s24 = scalar_lea.vmem %s3126_s19, 2048 }
  0x2f   : > { %2659 = vmatpush3.bf16.msra.mxu0 %v2998_v6  ;;  %2690 = vmatprep.subr.bf16.mxu1 %v3030_v26  ;;  %p3122_p0 = scmp.ne.s32.totalorder %s3857_s26, %s3121_s18  ;;  %p3128_p4 = scmp.lt.s32.totalorder %s3857_s26, %s3126_s19 }
  0x30   : > { %2660 = vmatprep.subr.bf16.mxu0 %v2999_v7  ;;  %p3129_p5 = scmp.lt.s32.totalorder %s3127_s24, %s3121_s18 }
  0x31   : > { %p3123_p1 = pnand %p3122_p0, %p3346_p3 }
  0x32   : > { %2691 = vmatpush3.bf16.msra.mxu1 %v3030_v26  ;;  %p3130_p6 = por %p3129_p5, %p3128_p4 }
  0x33   : > { %2661 = vmatpush3.bf16.msra.mxu0 %v2999_v7  ;;  %2692 = vmatprep.subr.bf16.mxu1 %v3031_v38  ;;  %p3124_p2 = pneg %p3123_p1 }
  0x34   : > { %2662 = vmatprep.subr.bf16.mxu0 %v3000_v8 }
  0x35   : > { %p3131_p7 = pnand %p3130_p6, %p3124_p2 }
  0x36   : > { %2693 = vmatpush3.bf16.msra.mxu1 %v3031_v38 }
  0x37   : > { %2663 = vmatpush3.bf16.msra.mxu0 %v3000_v8  ;;  %2694 = vmatprep.subr.bf16.mxu1 %v3032_v39 }
  0x38   : > { %2712 = vmatprep.subr.bf16.mxu0 %v3003_v9 }
  0x3a   : > { %2665 = vmatmul.mubr.bf16.vlgmr.msra.gmra.mrb[0].mxu0 %v3002_v10  ;;  %2695 = vmatpush3.bf16.msra.mxu1 %v3032_v39 }
  0x3b   : > { %2713 = vmatpush3.bf16.msra.mxu0 %v3003_v9  ;;  %2668 = vmatprep.mubr.bf16.mxu0 %v3005_v12 }
  0x3c   : > { %2714 = vmatprep.subr.bf16.mxu0 %v3004_v11  ;;  %2744 = vmatprep.subr.bf16.mxu1 %v3033_v40 }
  0x3f   : > { %2715 = vmatpush3.bf16.msra.mxu0 %v3004_v11  ;;  %v3036_v11 = vld [vmem:[%s3923_s8 + $0x18] sm:$0xff]  }
  0x40   : > { %2716 = vmatprep.subr.bf16.mxu0 %v3007_v16 }
  0x42   : > { %2669 = vmatmul.mubr.bf16.gmra.mrb[4].mxu0 %v3006_v15 }
  0x43   : > { %2717 = vmatpush3.bf16.msra.mxu0 %v3007_v16  ;;  %2672 = vmatprep.mubr.bf16.mxu0 %v3009_v17 }
  0x44   : > { %2718 = vmatprep.subr.bf16.mxu0 %v3008_v19 }
  0x47   : > { %2719 = vmatpush3.bf16.msra.mxu0 %v3008_v19  ;;  %v3037_v19 = vld [vmem:[%s3923_s8 + $0x20] sm:$0xff]  }
  0x48   : > { %2720 = vmatprep.subr.bf16.mxu0 %v3011_v21 }
  0x4a   : > { %2673 = vmatmul.mubr.bf16.gmra.mrb[8].mxu0 %v3010_v23 }
  0x4b   : > { %2721 = vmatpush3.bf16.msra.mxu0 %v3011_v21  ;;  %2676 = vmatprep.mubr.bf16.mxu0 %v3013_v24 }
  0x4c   : > { %2722 = vmatprep.subr.bf16.mxu0 %v3012_v25 }
  0x4f   : > { %2723 = vmatpush3.bf16.msra.mxu0 %v3012_v25 }
  0x50   : > { %2724 = vmatprep.subr.bf16.mxu0 %v3015_v27 }
  0x52   : > { %2677 = vmatmul.mubr.bf16.gmra.mrb[12].mxu0 %v3014_v28 }
  0x53   : > { %2725 = vmatpush3.bf16.msra.mxu0 %v3015_v27  ;;  %2728 = vmatprep.mubr.bf16.mxu0 %v3017_v29  ;;  %v3038_v27 = vld [vmem:[%s3923_s8 + $0x28] sm:$0xff]  }
  0x54   : > { %2726 = vmatprep.subr.bf16.mxu0 %v3016_v30 }
  0x57   : > { %2727 = vmatpush3.bf16.msra.mxu0 %v3016_v30 }
  0x5a   : > { %2729 = vmatmul.mubr.bf16.vlgmr.msra.gmra.mrb[16].mxu0 %v3459_v31 }
  0x5b   : > { %2732 = vmatprep.mubr.bf16.mxu0 %v3462_v32 }
  0x62   : > { %2733 = vmatmul.mubr.bf16.gmra.mrb[20].mxu0 %v3467_v33 }
  0x63   : > { %2736 = vmatprep.mubr.bf16.mxu0 %v3470_v34 }
  0x6a   : > { %2737 = vmatmul.mubr.bf16.gmra.mrb[24].mxu0 %v3475_v35 }
  0x6b   : > { %2740 = vmatprep.mubr.bf16.mxu0 %v3478_v36 }
  0x72   : > { %2741 = vmatmul.mubr.bf16.gmra.mrb[28].mxu0 %v3483_v37 }
  0x73   : > { %2792 = vmatprep.mubr.bf16.mxu0 %v3017_v29 }
 0x10d   : > { %v2666_v42 = vpop.f32.mrb[0].mxu0 }
 0x10e   : > { %v712_v43 = vadd.f32 %v2666_v42, %v3498_v41  ;;  %v703_v44 = vpop.f32.mrb[1].mxu0 }
 0x10f   : > { %v704_v45 = vadd.f32 %v3498_v41, %v703_v44  ;;  %v2667_v46 = vpop.f32.mrb[2].mxu0 }
 0x110   : > { %v715_v47 = vadd.f32 %v2667_v46, %v3498_v41  ;;  %v706_v48 = vpop.f32.mrb[3].mxu0  ;;  %v768_v50 = vmax.f32 %v712_v43, 0.0  ;;  %v3039_v43 = vld [vmem:[%s3923_s8 + $0x30] sm:$0xff]   ;;  %v3537_v46 = vld [vmem:[%s3922_s7] ss:$0 sm:$0xff] }
 0x111   : > { %v707_v49 = vadd.f32 %v3498_v41, %v706_v48  ;;  %v766_v52 = vmax.f32 %v704_v45, 0.0 }
 0x112   : > { %v769_v51 = vmax.f32 %v715_v47, 0.0 }
 0x113   : > { %v767_v53 = vmax.f32 %v707_v49, 0.0 }
 0x114   : > { %v783_v54 = vpack.c.bf16 %v769_v51, %v768_v50  ;;  %v3040_v51 = vld [vmem:[%s3923_s8 + $0x38] sm:$0xff]  }
 0x115   : > { %v2670_v55 = vpop.f32.mrb[4].mxu0  ;;  %v782_v56 = vpack.c.bf16 %v767_v53, %v766_v52 }
 0x116   : > { %v728_v57 = vadd.f32 %v2670_v55, %v3498_v41  ;;  %v719_v58 = vpop.f32.mrb[5].mxu0 }
 0x117   : > { %v720_v60 = vadd.f32 %v3498_v41, %v719_v58  ;;  %v2671_v61 = vpop.f32.mrb[6].mxu0  ;;  %2696 = vmatprep.mubr.bf16.mxu1 %v782_v56 }
 0x118   : > { %v731_v62 = vadd.f32 %v2671_v61, %v3498_v41  ;;  %v722_v63 = vpop.f32.mrb[7].mxu0  ;;  %2697 = vmatmul.mubr.bf16.vlgmr.msra.gmra.mrb[0].mxu1 %v783_v54  ;;  %v772_v1 = vmax.f32 %v728_v57, 0.0 }
 0x119   : > { %v723_v0 = vadd.f32 %v3498_v41, %v722_v63  ;;  %2745 = vmatpush3.bf16.msra.mxu1 %v3033_v40  ;;  %v770_v4 = vmax.f32 %v720_v60, 0.0 }
 0x11a   : > { %v773_v2 = vmax.f32 %v731_v62, 0.0  ;;  %2746 = vmatprep.subr.bf16.mxu1 %v3034_v59 }
 0x11b   : > { %v771_v5 = vmax.f32 %v723_v0, 0.0 }
 0x11c   : > { %v785_v6 = vpack.c.bf16 %v773_v2, %v772_v1 }
 0x11d   : > { %v784_v7 = vpack.c.bf16 %v771_v5, %v770_v4  ;;  %v2674_v8 = vpop.f32.mrb[8].mxu0  ;;  %2747 = vmatpush3.bf16.msra.mxu1 %v3034_v59 }
 0x11e   : > { %v744_v9 = vadd.f32 %v2674_v8, %v3498_v41  ;;  %v735_v10 = vpop.f32.mrb[9].mxu0  ;;  %2748 = vmatprep.subr.bf16.mxu1 %v3035_v3 }
 0x11f   : > { %v736_v12 = vadd.f32 %v3498_v41, %v735_v10  ;;  %v2675_v13 = vpop.f32.mrb[10].mxu0  ;;  %2700 = vmatprep.mubr.bf16.mxu1 %v784_v7 }
 0x120   : > { %v747_v14 = vadd.f32 %v2675_v13, %v3498_v41  ;;  %v738_v15 = vpop.f32.mrb[11].mxu0  ;;  %2701 = vmatmul.mubr.bf16.gmra.mrb[4].mxu1 %v785_v6  ;;  %v776_v17 = vmax.f32 %v744_v9, 0.0 }
 0x121   : > { %v739_v16 = vadd.f32 %v3498_v41, %v738_v15  ;;  %2749 = vmatpush3.bf16.msra.mxu1 %v3035_v3  ;;  %v774_v20 = vmax.f32 %v736_v12, 0.0 }
 0x122   : > { %v777_v18 = vmax.f32 %v747_v14, 0.0  ;;  %2750 = vmatprep.subr.bf16.mxu1 %v3036_v11 }
 0x123   : > { %v775_v21 = vmax.f32 %v739_v16, 0.0 }
 0x124   : > { %v787_v22 = vpack.c.bf16 %v777_v18, %v776_v17 }
 0x125   : > { %v786_v23 = vpack.c.bf16 %v775_v21, %v774_v20  ;;  %v2678_v24 = vpop.f32.mrb[12].mxu0  ;;  %2751 = vmatpush3.bf16.msra.mxu1 %v3036_v11 }
 0x126   : > { %v760_v25 = vadd.f32 %v2678_v24, %v3498_v41  ;;  %v751_v26 = vpop.f32.mrb[13].mxu0  ;;  %2752 = vmatprep.subr.bf16.mxu1 %v3037_v19 }
 0x127   : > { %v752_v28 = vadd.f32 %v3498_v41, %v751_v26  ;;  %v2679_v29 = vpop.f32.mrb[14].mxu0  ;;  %2704 = vmatprep.mubr.bf16.mxu1 %v786_v23 }
 0x128   : > { %v763_v30 = vadd.f32 %v2679_v29, %v3498_v41  ;;  %v754_v38 = vpop.f32.mrb[15].mxu0  ;;  %2705 = vmatmul.mubr.bf16.gmra.mrb[8].mxu1 %v787_v22  ;;  %v780_v40 = vmax.f32 %v760_v25, 0.0 }
 0x129   : > { %v755_v39 = vadd.f32 %v3498_v41, %v754_v38  ;;  %2753 = vmatpush3.bf16.msra.mxu1 %v3037_v19  ;;  %v778_v44 = vmax.f32 %v752_v28, 0.0 }
 0x12a   : > { %v781_v42 = vmax.f32 %v763_v30, 0.0  ;;  %2754 = vmatprep.subr.bf16.mxu1 %v3038_v27 }
 0x12b   : > { %v779_v45 = vmax.f32 %v755_v39, 0.0 }
 0x12c   : > { %v789_v47 = vpack.c.bf16 %v781_v42, %v780_v40 }
 0x12d   : > { %v788_v48 = vpack.c.bf16 %v779_v45, %v778_v44  ;;  %v2730_v49 = vpop.f32.mrb[16].mxu0  ;;  %2755 = vmatpush3.bf16.msra.mxu1 %v3038_v27 }
 0x12e   : > { %v1136_v41 = vadd.f32 %v2730_v49, %v3537_v46  ;;  %v1127_v50 = vpop.f32.mrb[17].mxu0  ;;  %2756 = vmatprep.subr.bf16.mxu1 %v3039_v43 }
 0x12f   : > { %v1128_v52 = vadd.f32 %v3537_v46, %v1127_v50  ;;  %2708 = vmatprep.mubr.bf16.mxu1 %v788_v48  ;;  %v2731_v53 = vpop.f32.mrb[18].mxu0 }
 0x130   : > { %v1139_v54 = vadd.f32 %v2731_v53, %v3537_v46  ;;  %2709 = vmatmul.mubr.bf16.gmra.mrb[12].mxu1 %v789_v47  ;;  %v1130_v55 = vpop.f32.mrb[19].mxu0  ;;  %v1192_v57 = vmax.f32 %v1136_v41, 0.0  ;;  %v2381_v41 = vld [vmem:[%s3920_s5] ss:$0 sm:$0xff] }
 0x131   : > { %v1131_v56 = vadd.f32 %v3537_v46, %v1130_v55  ;;  %2757 = vmatpush3.bf16.msra.mxu1 %v3039_v43  ;;  %v1190_v59 = vmax.f32 %v1128_v52, 0.0 }
 0x132   : > { %v1193_v58 = vmax.f32 %v1139_v54, 0.0  ;;  %2758 = vmatprep.subr.bf16.mxu1 %v3040_v51 }
 0x133   : > { %v1191_v60 = vmax.f32 %v1131_v56, 0.0 }
 0x134   : > { %v1207_v61 = vpack.c.bf16 %v1193_v58, %v1192_v57 }
 0x135   : > { %v1206_v62 = vpack.c.bf16 %v1191_v60, %v1190_v59  ;;  %2759 = vmatpush3.bf16.msra.mxu1 %v3040_v51  ;;  %v2734_v63 = vpop.f32.mrb[20].mxu0 }
 0x136   : > { %v1152_v0 = vadd.f32 %v2734_v63, %v3537_v46  ;;  %v1143_v1 = vpop.f32.mrb[21].mxu0 }
 0x137   : > { %2760 = vmatprep.mubr.bf16.mxu1 %v1206_v62  ;;  %v1144_v2 = vadd.f32 %v3537_v46, %v1143_v1  ;;  %v2735_v3 = vpop.f32.mrb[22].mxu0 }
 0x138   : > { %v1196_v4 = vmax.f32 %v1152_v0, 0.0  ;;  %2761 = vmatmul.mubr.bf16.vlgmr.msra.gmra.mrb[16].mxu1 %v1207_v61  ;;  %v1155_v5 = vadd.f32 %v2735_v3, %v3537_v46  ;;  %v1146_v6 = vpop.f32.mrb[23].mxu0 }
 0x139   : > { %v1194_v7 = vmax.f32 %v1144_v2, 0.0  ;;  %v1147_v8 = vadd.f32 %v3537_v46, %v1146_v6 }
 0x13a   : > { %v1197_v9 = vmax.f32 %v1155_v5, 0.0 }
 0x13b   : > { %v1195_v10 = vmax.f32 %v1147_v8, 0.0 }
 0x13c   : > { %v1209_v11 = vpack.c.bf16 %v1197_v9, %v1196_v4 }
 0x13d   : > { %v1208_v12 = vpack.c.bf16 %v1195_v10, %v1194_v7  ;;  %v2738_v13 = vpop.f32.mrb[24].mxu0 }
 0x13e   : > { %v1168_v14 = vadd.f32 %v2738_v13, %v3537_v46  ;;  %v1159_v15 = vpop.f32.mrb[25].mxu0 }
 0x13f   : > { %2764 = vmatprep.mubr.bf16.mxu1 %v1208_v12  ;;  %v1160_v16 = vadd.f32 %v3537_v46, %v1159_v15  ;;  %v2739_v17 = vpop.f32.mrb[26].mxu0 }
 0x140   : > { %2765 = vmatmul.mubr.bf16.gmra.mrb[20].mxu1 %v1209_v11  ;;  %v1200_v18 = vmax.f32 %v1168_v14, 0.0  ;;  %v1171_v19 = vadd.f32 %v2739_v17, %v3537_v46  ;;  %v1162_v20 = vpop.f32.mrb[27].mxu0 }
 0x141   : > { %v1198_v21 = vmax.f32 %v1160_v16, 0.0  ;;  %v1163_v22 = vadd.f32 %v3537_v46, %v1162_v20 }
 0x142   : > { %v1201_v23 = vmax.f32 %v1171_v19, 0.0 }
 0x143   : > { %v1199_v24 = vmax.f32 %v1163_v22, 0.0 }
 0x144   : > { %v1211_v25 = vpack.c.bf16 %v1201_v23, %v1200_v18 }
 0x145   : > { %v1210_v26 = vpack.c.bf16 %v1199_v24, %v1198_v21  ;;  %v2742_v27 = vpop.f32.mrb[28].mxu0 }
 0x146   : > { %v1184_v28 = vadd.f32 %v2742_v27, %v3537_v46  ;;  %v1175_v29 = vpop.f32.mrb[29].mxu0 }
 0x147   : > { %2768 = vmatprep.mubr.bf16.mxu1 %v1210_v26  ;;  %v1176_v30 = vadd.f32 %v3537_v46, %v1175_v29  ;;  %v2743_v38 = vpop.f32.mrb[30].mxu0 }
 0x148   : > { %2769 = vmatmul.mubr.bf16.gmra.mrb[24].mxu1 %v1211_v25  ;;  %v1204_v39 = vmax.f32 %v1184_v28, 0.0  ;;  %v1187_v40 = vadd.f32 %v2743_v38, %v3537_v46  ;;  %v1178_v42 = vpop.f32.mrb[31].mxu0 }
 0x149   : > { %v1202_v43 = vmax.f32 %v1176_v30, 0.0  ;;  %v1179_v44 = vadd.f32 %v3537_v46, %v1178_v42 }
 0x14a   : > { %v1205_v45 = vmax.f32 %v1187_v40, 0.0 }
 0x14b   : > { %v1203_v47 = vmax.f32 %v1179_v44, 0.0 }
 0x14c   : > { %v1213_v48 = vpack.c.bf16 %v1205_v45, %v1204_v39 }
 0x14d   : > { %v1212_v49 = vpack.c.bf16 %v1203_v47, %v1202_v43 }
 0x14f   : > { %2772 = vmatprep.mubr.bf16.mxu1 %v1212_v49 }
 0x150   : > { %2773 = vmatmul.mubr.bf16.gmra.mrb[28].mxu1 %v1213_v48  ;;  %v2407_v48 = vld [vmem:[%s3924_s9] ss:$0 sm:$0xff] }
 0x1eb   : > { %v2698_v50 = vpop.f32.mrb[0].mxu1 }
 0x1ec   : > { %v904_v51 = vadd.f32 %v2698_v50, %v2381_v41  ;;  %v895_v52 = vpop.f32.mrb[1].mxu1 }
 0x1ed   : > { %v896_v53 = vadd.f32 %v2381_v41, %v895_v52  ;;  %v2699_v54 = vpop.f32.mrb[2].mxu1 }
 0x1ee   : > { %v907_v55 = vadd.f32 %v2699_v54, %v2381_v41  ;;  %v898_v56 = vpop.f32.mrb[3].mxu1  ;;  %v960_v58 = vmax.f32 %v904_v51, 0.0 }
 0x1ef   : > { %v899_v57 = vadd.f32 %v2381_v41, %v898_v56  ;;  %v958_v59 = vmax.f32 %v896_v53, 0.0 }
 0x1f0   : > { %v961_v46 = vmax.f32 %v907_v55, 0.0 }
 0x1f1   : > { %v959_v60 = vmax.f32 %v899_v57, 0.0 }
 0x1f2   : > { %v3561_v61 = vpack.c.bf16 %v961_v46, %v960_v58 }
 0x1f3   : > { %v1582_v62 = vpack.c.bf16 %v959_v60, %v958_v59  ;;  %v2702_v63 = vpop.f32.mrb[4].mxu1 }
 0x1f4   : > { %v920_v0 = vadd.f32 %v2702_v63, %v2381_v41  ;;  %v911_v1 = vpop.f32.mrb[5].mxu1 }
 0x1f5   : > { %v912_v2 = vadd.f32 %v2381_v41, %v911_v1  ;;  %v2703_v3 = vpop.f32.mrb[6].mxu1  ;;  %2824 = vmatprep.mubr.bf16.mxu1 %v1582_v62 }
 0x1f6   : > { %v923_v4 = vadd.f32 %v2703_v3, %v2381_v41  ;;  %v914_v5 = vpop.f32.mrb[7].mxu1  ;;  %v964_v7 = vmax.f32 %v920_v0, 0.0 }
 0x1f7   : > { %v915_v6 = vadd.f32 %v2381_v41, %v914_v5  ;;  %v962_v9 = vmax.f32 %v912_v2, 0.0 }
 0x1f8   : > { %v965_v8 = vmax.f32 %v923_v4, 0.0 }
 0x1f9   : > { %v963_v10 = vmax.f32 %v915_v6, 0.0 }
 0x1fa   : > { %v3563_v11 = vpack.c.bf16 %v965_v8, %v964_v7 }
 0x1fb   : > { %v3565_v12 = vpack.c.bf16 %v963_v10, %v962_v9  ;;  %v2706_v13 = vpop.f32.mrb[8].mxu1 }
 0x1fc   : > { %v936_v14 = vadd.f32 %v2706_v13, %v2381_v41  ;;  %v927_v15 = vpop.f32.mrb[9].mxu1 }
 0x1fd   : > { %v928_v16 = vadd.f32 %v2381_v41, %v927_v15  ;;  %v2707_v17 = vpop.f32.mrb[10].mxu1 }
 0x1fe   : > { %v939_v18 = vadd.f32 %v2707_v17, %v2381_v41  ;;  %v930_v19 = vpop.f32.mrb[11].mxu1  ;;  %v968_v21 = vmax.f32 %v936_v14, 0.0 }
 0x1ff   : > { %v931_v20 = vadd.f32 %v2381_v41, %v930_v19  ;;  %v966_v23 = vmax.f32 %v928_v16, 0.0 }
 0x200   : > { %v969_v22 = vmax.f32 %v939_v18, 0.0 }
 0x201   : > { %v967_v24 = vmax.f32 %v931_v20, 0.0 }
 0x202   : > { %v3567_v25 = vpack.c.bf16 %v969_v22, %v968_v21 }
 0x203   : > { %v3569_v26 = vpack.c.bf16 %v967_v24, %v966_v23  ;;  %v2710_v27 = vpop.f32.mrb[12].mxu1 }
 0x204   : > { %v952_v28 = vadd.f32 %v2710_v27, %v2381_v41  ;;  %v943_v29 = vpop.f32.mrb[13].mxu1 }
 0x205   : > { %v944_v30 = vadd.f32 %v2381_v41, %v943_v29  ;;  %v2711_v38 = vpop.f32.mrb[14].mxu1 }
 0x206   : > { %v955_v39 = vadd.f32 %v2711_v38, %v2381_v41  ;;  %v946_v40 = vpop.f32.mrb[15].mxu1  ;;  %v972_v43 = vmax.f32 %v952_v28, 0.0 }
 0x207   : > { %v947_v42 = vadd.f32 %v2381_v41, %v946_v40  ;;  %v970_v45 = vmax.f32 %v944_v30, 0.0 }
 0x208   : > { %v973_v44 = vmax.f32 %v955_v39, 0.0 }
 0x209   : > { %v971_v47 = vmax.f32 %v947_v42, 0.0 }
 0x20a   : > { %v3574_v49 = vpack.c.bf16 %v973_v44, %v972_v43 }
 0x20b   : > { %v3576_v50 = vpack.c.bf16 %v971_v47, %v970_v45  ;;  %v2762_v51 = vpop.f32.mrb[16].mxu1 }
 0x20c   : > { %v1328_v52 = vadd.f32 %v2762_v51, %v2407_v48  ;;  %v1319_v53 = vpop.f32.mrb[17].mxu1 }
 0x20d   : > { %v1320_v54 = vadd.f32 %v2407_v48, %v1319_v53  ;;  %v2763_v55 = vpop.f32.mrb[18].mxu1 }
 0x20e   : > { %v1331_v56 = vadd.f32 %v2763_v55, %v2407_v48  ;;  %v1322_v57 = vpop.f32.mrb[19].mxu1  ;;  %v1384_v58 = vmax.f32 %v1328_v52, 0.0 }
 0x20f   : > { %v1323_v41 = vadd.f32 %v2407_v48, %v1322_v57  ;;  %v1382_v59 = vmax.f32 %v1320_v54, 0.0 }
 0x210   : > { %v1385_v46 = vmax.f32 %v1331_v56, 0.0 }
 0x211   : > { %v1383_v60 = vmax.f32 %v1323_v41, 0.0  ;;  %v1695_v41 = vlaneseq }
 0x212   : > { %v1591_v62 = vpack.c.bf16 %v1385_v46, %v1384_v58 }
 0x213   : > { %v1590_v63 = vpack.c.bf16 %v1383_v60, %v1382_v59  ;;  %v2766_v0 = vpop.f32.mrb[20].mxu1  ;;  %v1696_v58 = vand.u32 127, %v1695_v41 }
 0x214   : > { %v1344_v1 = vadd.f32 %v2766_v0, %v2407_v48  ;;  %v1335_v2 = vpop.f32.mrb[21].mxu1 }
 0x215   : > { %2808 = vmatprep.subr.bf16.mxu1 %v1590_v63  ;;  %v1336_v3 = vadd.f32 %v2407_v48, %v1335_v2  ;;  %v2767_v4 = vpop.f32.mrb[22].mxu1  ;;  %vm1697_vm0 = vcmp.lt.s32.totalorder %v1696_v58, 8 }
 0x216   : > { %v1388_v5 = vmax.f32 %v1344_v1, 0.0  ;;  %2809 = vmatpush3.bf16.xpose.msra.mxu1 %v1590_v63  ;;  %v1347_v6 = vadd.f32 %v2767_v4, %v2407_v48  ;;  %v1338_v7 = vpop.f32.mrb[23].mxu1 }
 0x217   : > { %v1386_v8 = vmax.f32 %v1336_v3, 0.0  ;;  %2810 = vmatprep.subr.bf16.mxu1 %v1591_v62  ;;  %v1339_v9 = vadd.f32 %v2407_v48, %v1338_v7 }
 0x218   : > { %v1389_v10 = vmax.f32 %v1347_v6, 0.0 }
 0x219   : > { %v1387_v13 = vmax.f32 %v1339_v9, 0.0 }
 0x21a   : > { %v1593_v14 = vpack.c.bf16 %v1389_v10, %v1388_v5 }
 0x21b   : > { %v1592_v15 = vpack.c.bf16 %v1387_v13, %v1386_v8  ;;  %v2770_v16 = vpop.f32.mrb[24].mxu1 }
 0x21c   : > { %v1360_v17 = vadd.f32 %v2770_v16, %v2407_v48  ;;  %v1351_v18 = vpop.f32.mrb[25].mxu1 }
 0x21d   : > { %v1352_v19 = vadd.f32 %v2407_v48, %v1351_v18  ;;  %v2771_v20 = vpop.f32.mrb[26].mxu1 }
 0x21e   : > { %2811 = vmatpush3.bf16.xpose.msra.mxu1 %v1591_v62  ;;  %v1392_v21 = vmax.f32 %v1360_v17, 0.0  ;;  %v1363_v22 = vadd.f32 %v2771_v20, %v2407_v48  ;;  %v1354_v23 = vpop.f32.mrb[27].mxu1 }
 0x21f   : > { %2812 = vmatprep.subr.bf16.mxu1 %v1592_v15  ;;  %v1390_v24 = vmax.f32 %v1352_v19, 0.0  ;;  %v1355_v27 = vadd.f32 %v2407_v48, %v1354_v23 }
 0x220   : > { %v1393_v28 = vmax.f32 %v1363_v22, 0.0 }
 0x221   : > { %v1391_v29 = vmax.f32 %v1355_v27, 0.0 }
 0x222   : > { %v1595_v30 = vpack.c.bf16 %v1393_v28, %v1392_v21  ;;  %v3674_v28 = vld [vmem:[%s3926_s11] ss:$0 sm:$0xff] }
 0x223   : > { %v1594_v38 = vpack.c.bf16 %v1391_v29, %v1390_v24  ;;  %v2774_v39 = vpop.f32.mrb[28].mxu1 }
 0x224   : > { %v1376_v40 = vadd.f32 %v2774_v39, %v2407_v48  ;;  %v1367_v42 = vpop.f32.mrb[29].mxu1 }
 0x225   : > { %v1368_v43 = vadd.f32 %v2407_v48, %v1367_v42  ;;  %v2775_v44 = vpop.f32.mrb[30].mxu1 }
 0x226   : > { %2813 = vmatpush3.bf16.xpose.msra.mxu1 %v1592_v15  ;;  %v1396_v45 = vmax.f32 %v1376_v40, 0.0  ;;  %v1379_v47 = vadd.f32 %v2775_v44, %v2407_v48  ;;  %v1370_v51 = vpop.f32.mrb[31].mxu1 }
 0x227   : > { %2814 = vmatprep.subr.bf16.mxu1 %v1593_v14  ;;  %v1394_v52 = vmax.f32 %v1368_v43, 0.0  ;;  %v1371_v53 = vadd.f32 %v2407_v48, %v1370_v51  ;;  %v3041_v48 = vld [vmem:[%s3925_s10] sm:$0xff]  }
 0x228   : > { %v1397_v54 = vmax.f32 %v1379_v47, 0.0  ;;  %2776 = vmatprep.subr.bf16.mxu0 %v3041_v48 }
 0x229   : > { %v1395_v55 = vmax.f32 %v1371_v53, 0.0  ;;  %2777 = vmatpush3.bf16.msra.mxu0 %v3041_v48 }
 0x22a   : > { %v1597_v56 = vpack.c.bf16 %v1397_v54, %v1396_v45 }
 0x22b   : > { %v1596_v57 = vpack.c.bf16 %v1395_v55, %v1394_v52 }
 0x22e   : > { %2815 = vmatpush3.bf16.xpose.msra.mxu1 %v1593_v14 }
 0x22f   : > { %2816 = vmatprep.subr.bf16.mxu1 %v1594_v38 }
 0x236   : > { %2817 = vmatpush3.bf16.xpose.msra.mxu1 %v1594_v38 }
 0x237   : > { %2818 = vmatprep.subr.bf16.mxu1 %v1595_v30 }
 0x23e   : > { %2819 = vmatpush3.bf16.xpose.msra.mxu1 %v1595_v30 }
 0x23f   : > { %2820 = vmatprep.subr.bf16.mxu1 %v1596_v57 }
 0x246   : > { %2821 = vmatpush3.bf16.xpose.msra.mxu1 %v1596_v57 }
 0x247   : > { %2822 = vmatprep.subr.bf16.mxu1 %v1597_v56 }
 0x24e   : > { %2823 = vmatpush3.bf16.xpose.msra.mxu1 %v1597_v56 }
 0x255   : > { %2825 = vmatmul.mubr.bf16.vlgmr.msra.gmra.mrb[32].mxu1 %v3561_v61  ;;  %v3042_v61 = vld [vmem:[%s3925_s10 + $0x8] sm:$0xff]  }
 0x256   : > { %2828 = vmatprep.mubr.bf16.mxu1 %v3565_v12  ;;  %2778 = vmatprep.subr.bf16.mxu0 %v3042_v61  ;;  %v3044_v12 = vld [vmem:[%s3925_s10 + $0x18] sm:$0xff]  }
 0x257   : > { %2779 = vmatpush3.bf16.msra.mxu0 %v3042_v61 }
 0x25d   : > { %2829 = vmatmul.mubr.bf16.gmra.mrb[36].mxu1 %v3563_v11  ;;  %v3043_v11 = vld [vmem:[%s3925_s10 + $0x10] sm:$0xff]  }
 0x25e   : > { %2832 = vmatprep.mubr.bf16.mxu1 %v3569_v26  ;;  %2780 = vmatprep.subr.bf16.mxu0 %v3043_v11  ;;  %v3046_v26 = vld [vmem:[%s3925_s10 + $0x28] sm:$0xff]  }
 0x25f   : > { %2781 = vmatpush3.bf16.msra.mxu0 %v3043_v11 }
 0x260   : > { %2782 = vmatprep.subr.bf16.mxu0 %v3044_v12 }
 0x263   : > { %2783 = vmatpush3.bf16.msra.mxu0 %v3044_v12 }
 0x265   : > { %2833 = vmatmul.mubr.bf16.gmra.mrb[40].mxu1 %v3567_v25  ;;  %v3045_v25 = vld [vmem:[%s3925_s10 + $0x20] sm:$0xff]  }
 0x266   : > { %2836 = vmatprep.mubr.bf16.mxu1 %v3576_v50  ;;  %2784 = vmatprep.subr.bf16.mxu0 %v3045_v25  ;;  %v3048_v50 = vld [vmem:[%s3925_s10 + $0x38] sm:$0xff]  }
 0x267   : > { %2785 = vmatpush3.bf16.msra.mxu0 %v3045_v25 }
 0x268   : > { %2786 = vmatprep.subr.bf16.mxu0 %v3046_v26 }
 0x26b   : > { %2787 = vmatpush3.bf16.msra.mxu0 %v3046_v26 }
 0x26d   : > { %2837 = vmatmul.mubr.bf16.gmra.mrb[44].mxu1 %v3574_v49  ;;  %v3047_v49 = vld [vmem:[%s3925_s10 + $0x30] sm:$0xff]  }
 0x26e   : > { %2788 = vmatprep.subr.bf16.mxu0 %v3047_v49 }
 0x26f   : > { %2789 = vmatpush3.bf16.msra.mxu0 %v3047_v49 }
 0x270   : > { %2790 = vmatprep.subr.bf16.mxu0 %v3048_v50 }
 0x273   : > { %2791 = vmatpush3.bf16.msra.mxu0 %v3048_v50 }
 0x276   : > { %2793 = vmatmul.mubr.bf16.vlgmr.msra.gmra.mrb[32].mxu0 %v3459_v31 }
 0x277   : > { %2796 = vmatprep.mubr.bf16.mxu0 %v3462_v32 }
 0x27e   : > { %2797 = vmatmul.mubr.bf16.gmra.mrb[36].mxu0 %v3467_v33 }
 0x27f   : > { %2800 = vmatprep.mubr.bf16.mxu0 %v3470_v34 }
 0x286   : > { %2801 = vmatmul.mubr.bf16.gmra.mrb[40].mxu0 %v3475_v35 }
 0x287   : > { %2804 = vmatprep.mubr.bf16.mxu0 %v3478_v36 }
 0x28e   : > { %2805 = vmatmul.mubr.bf16.gmra.mrb[44].mxu0 %v3483_v37 }
 0x328   : > { %v2826_v46 = vpop.f32.mrb[32].mxu1 }
 0x329   : > { %v1632_v59 = vpop.f32.mrb[33].mxu1  ;;  %v1700_v60 = vsel %vm1697_vm0, %v2826_v46, -1e+30 }
 0x32a   : > { %1718 = vmax.xlane.f32.xlu1 %v1700_v60  ;;  %v2827_v31 = vpop.f32.mrb[34].mxu1  ;;  %v1698_v32 = vsel %vm1697_vm0, %v1632_v59, -1e+30 }
 0x32b   : > { %1714 = vmax.xlane.f32.xlu0 %v1698_v32  ;;  %v1635_v33 = vpop.f32.mrb[35].mxu1  ;;  %v3619_v34 = vsel %vm1697_vm0, %v2827_v31, -1e+30 }
 0x32c   : > { %v1699_v35 = vsel %vm1697_vm0, %v1635_v33, -1e+30 }
 0x32e   : > { %1720 = vmax.xlane.f32.xlu1 %v3619_v34 }
 0x32f   : > { %1716 = vmax.xlane.f32.xlu0 %v1699_v35 }
 0x330   : > { %v2830_v36 = vpop.f32.mrb[36].mxu1 }
 0x331   : > { %v1648_v37 = vpop.f32.mrb[37].mxu1  ;;  %v3632_v2 = vsel %vm1697_vm0, %v2830_v36, -1e+30 }
 0x332   : > { %v2831_v62 = vpop.f32.mrb[38].mxu1  ;;  %v3624_v63 = vsel %vm1697_vm0, %v1648_v37, -1e+30 }
 0x333   : > { %1722 = vmax.xlane.f32.xlu0 %v3624_v63  ;;  %v1651_v0 = vpop.f32.mrb[39].mxu1  ;;  %v3636_v4 = vsel %vm1697_vm0, %v2831_v62, -1e+30 }
 0x334   : > { %v3628_v1 = vsel %vm1697_vm0, %v1651_v0, -1e+30 }
 0x335   : > { %1724 = vmax.xlane.f32.xlu1 %v3628_v1 }
 0x337   : > { %1726 = vmax.xlane.f32.xlu0 %v3632_v2 }
 0x338   : > { %v2834_v3 = vpop.f32.mrb[40].mxu1 }
 0x339   : > { %1728 = vmax.xlane.f32.xlu1 %v3636_v4  ;;  %v1664_v5 = vpop.f32.mrb[41].mxu1  ;;  %v3648_v10 = vsel %vm1697_vm0, %v2834_v3, -1e+30 }
 0x33a   : > { %v2835_v6 = vpop.f32.mrb[42].mxu1  ;;  %v3640_v7 = vsel %vm1697_vm0, %v1664_v5, -1e+30 }
 0x33b   : > { %1730 = vmax.xlane.f32.xlu0 %v3640_v7  ;;  %v1667_v8 = vpop.f32.mrb[43].mxu1  ;;  %v3652_v14 = vsel %vm1697_vm0, %v2835_v6, -1e+30 }
 0x33c   : > { %v3644_v9 = vsel %vm1697_vm0, %v1667_v8, -1e+30 }
 0x33d   : > { %1732 = vmax.xlane.f32.xlu1 %v3644_v9 }
 0x33f   : > { %1734 = vmax.xlane.f32.xlu0 %v3648_v10 }
 0x340   : > { %v2838_v13 = vpop.f32.mrb[44].mxu1 }
 0x341   : > { %1736 = vmax.xlane.f32.xlu1 %v3652_v14  ;;  %v1680_v15 = vpop.f32.mrb[45].mxu1  ;;  %v3664_v20 = vsel %vm1697_vm0, %v2838_v13, -1e+30 }
 0x342   : > { %v2839_v16 = vpop.f32.mrb[46].mxu1  ;;  %v3656_v17 = vsel %vm1697_vm0, %v1680_v15, -1e+30 }
 0x343   : > { %1738 = vmax.xlane.f32.xlu0 %v3656_v17  ;;  %v1683_v18 = vpop.f32.mrb[47].mxu1  ;;  %v3668_v21 = vsel %vm1697_vm0, %v2839_v16, -1e+30 }
 0x344   : > { %v3660_v19 = vsel %vm1697_vm0, %v1683_v18, -1e+30 }
 0x345   : > { %1740 = vmax.xlane.f32.xlu1 %v3660_v19 }
 0x347   : > { %1742 = vmax.xlane.f32.xlu0 %v3664_v20 }
 0x349   : > { %1744 = vmax.xlane.f32.xlu1 %v3668_v21  ;;  %v2794_v38 = vpop.f32.mrb[32].mxu0 }
 0x34a   : > { %v1512_v43 = vadd.f32 %v2794_v38, %v3674_v28  ;;  %v1503_v44 = vpop.f32.mrb[33].mxu0 }
 0x34b   : > { %v1504_v47 = vadd.f32 %v3674_v28, %v1503_v44  ;;  %v2795_v51 = vpop.f32.mrb[34].mxu0 }
 0x34c   : > { %v1568_v52 = vmax.f32 %v1512_v43, 0.0  ;;  %v1515_v53 = vadd.f32 %v2795_v51, %v3674_v28  ;;  %v1506_v54 = vpop.f32.mrb[35].mxu0 }
 0x34d   : > { %v1566_v56 = vmax.f32 %v1504_v47, 0.0  ;;  %v1507_v57 = vadd.f32 %v3674_v28, %v1506_v54 }
 0x34e   : > { %v1569_v11 = vmax.f32 %v1515_v53, 0.0 }
 0x34f   : > { %v1567_v25 = vmax.f32 %v1507_v57, 0.0 }
 0x350   : > { %v1867_v49 = vpack.c.bf16 %v1569_v11, %v1568_v52 }
 0x351   : > { %v1866_v58 = vpack.c.bf16 %v1567_v25, %v1566_v56  ;;  %v2798_v46 = vpop.f32.mrb[36].mxu0 }
 0x352   : > { %v1519_v31 = vpop.f32.mrb[37].mxu0 }
 0x353   : > { %2840 = vmatprep.subr.bf16.mxu0 %v1866_v58 }
 0x354   : > { %2841 = vmatpush3.bf16.msra.mxu0 %v1866_v58 }
 0x355   : > { %2842 = vmatprep.subr.bf16.mxu0 %v1867_v49 }
 0x358   : > { %2843 = vmatpush3.bf16.msra.mxu0 %v1867_v49 }
 0x3b7   : > { %v1719_v22 = vpop.xlane.xlu1 %1718 }
 0x3b8   : > { %v1748_v23 = vsub.f32 %v1700_v60, %v1719_v22  ;;  %v1715_v24 = vpop.xlane.xlu0 %1714  ;;  %v1528_v60 = vadd.f32 %v2798_v46, %v3674_v28 }
 0x3b9   : > { %v1746_v27 = vsub.f32 %v1698_v32, %v1715_v24 }
 0x3ba   : > { %v1766_v39 = vmul.f32 1.442695, %v1748_v23  ;;  %v1572_v37 = vmax.f32 %v1528_v60, 0.0 }
 0x3bb   : > { %v1762_v29 = vmul.f32 1.442695, %v1746_v27  ;;  %v1721_v30 = vpop.xlane.xlu1 %1720 }
 0x3bc   : > { %v1749_v40 = vsub.f32 %v3619_v34, %v1721_v30  ;;  %v1717_v42 = vpop.xlane.xlu0 %1716  ;;  %v1520_v34 = vadd.f32 %v3674_v28, %v1519_v31 }
 0x3bd   : > { %3057 = vpow2.f32 %v1762_v29  ;;  %v1747_v45 = vsub.f32 %v1699_v35, %v1717_v42  ;;  %v2799_v35 = vpop.f32.mrb[38].mxu0 }
 0x3be   : > { %3059 = vpow2.f32 %v1766_v39  ;;  %v1768_v48 = vmul.f32 1.442695, %v1749_v40  ;;  %v1531_v62 = vadd.f32 %v2799_v35, %v3674_v28 }
 0x3bf   : > { %v1764_v55 = vmul.f32 1.442695, %v1747_v45 }
 0x3c0   : > { %v1723_v61 = vpop.xlane.xlu0 %1722  ;;  %v1573_v6 = vmax.f32 %v1531_v62, 0.0 }
 0x3c1   : > { %3061 = vpow2.f32 %v1764_v55  ;;  %v1750_v12 = vsub.f32 %v3624_v63, %v1723_v61  ;;  %v1522_v63 = vpop.f32.mrb[39].mxu0 }
 0x3c2   : > { %v1725_v26 = vpop.xlane.xlu1 %1724  ;;  %3063 = vpow2.f32 %v1768_v48  ;;  %v1523_v8 = vadd.f32 %v3674_v28, %v1522_v63  ;;  %v1869_v22 = vpack.c.bf16 %v1573_v6, %v1572_v37  ;;  %v2802_v29 = vpop.f32.mrb[40].mxu0 }
 0x3c3   : > { %v1770_v50 = vmul.f32 1.442695, %v1750_v12  ;;  %v1751_v41 = vsub.f32 %v3628_v1, %v1725_v26  ;;  %v1535_v39 = vpop.f32.mrb[41].mxu0 }
 0x3c4   : > { %v1727_v59 = vpop.xlane.xlu0 %1726  ;;  %v1571_v23 = vmax.f32 %v1523_v8, 0.0  ;;  %v1536_v43 = vadd.f32 %v3674_v28, %v1535_v39  ;;  %v2803_v44 = vpop.f32.mrb[42].mxu0  ;;  %v3784_v39 = vld [vmem:[%s3927_s12 + $0x20] sm:$0xff]  }
 0x3c5   : > { %3065 = vpow2.f32 %v1770_v50  ;;  %v1772_v32 = vmul.f32 1.442695, %v1751_v41  ;;  %v1752_v33 = vsub.f32 %v3632_v2, %v1727_v59  ;;  %v1570_v2 = vmax.f32 %v1520_v34, 0.0  ;;  %v1538_v52 = vpop.f32.mrb[43].mxu0 }
 0x3c6   : > { %v1729_v36 = vpop.xlane.xlu1 %1728  ;;  %v1547_v51 = vadd.f32 %v2803_v44, %v3674_v28  ;;  %v1574_v56 = vmax.f32 %v1536_v43, 0.0  ;;  %v1539_v48 = vadd.f32 %v3674_v28, %v1538_v52  ;;  %v2806_v58 = vpop.f32.mrb[44].mxu0 }
 0x3c7   : > { %v3687_v0 = vpop.eup %3057  ;;  %v1774_v1 = vmul.f32 1.442695, %v1752_v33  ;;  %v1753_v3 = vsub.f32 %v3636_v4, %v1729_v36  ;;  %3067 = vpow2.f32 %v1772_v32  ;;  %v1868_v38 = vpack.c.bf16 %v1571_v23, %v1570_v2  ;;  %v1551_v60 = vpop.f32.mrb[45].mxu0 }
 0x3c8   : > { %v1731_v5 = vpop.xlane.xlu0 %1730  ;;  %1794 = vadd.xlane.f32.xlu0 %v3687_v0  ;;  %v3693_v16 = vpop.eup %3059  ;;  %v1577_v57 = vmax.f32 %v1547_v51, 0.0  ;;  %v1575_v26 = vmax.f32 %v1539_v48, 0.0  ;;  %v1560_v59 = vadd.f32 %v2806_v58, %v3674_v28  ;;  %v1552_v33 = vadd.f32 %v3674_v28, %v1551_v60 }
 0x3c9   : > { %3069 = vpow2.f32 %v1774_v1  ;;  %v1776_v13 = vmul.f32 1.442695, %v1753_v3  ;;  %v1754_v15 = vsub.f32 %v3640_v7, %v1731_v5  ;;  %v1544_v7 = vadd.f32 %v2802_v29, %v3674_v28  ;;  %2844 = vmatprep.subr.bf16.mxu0 %v1868_v38  ;;  %v2807_v34 = vpop.f32.mrb[46].mxu0  ;;  %v3756_v29 = vld [vmem:[%s3927_s12] sm:$0xff]  }
 0x3ca   : > { %v1733_v18 = vpop.xlane.xlu1 %1732  ;;  %2845 = vmatpush3.bf16.msra.mxu0 %v1868_v38  ;;  %v1580_v36 = vmax.f32 %v1560_v59, 0.0  ;;  %v1563_v37 = vadd.f32 %v2807_v34, %v3674_v28  ;;  %v1554_v62 = vpop.f32.mrb[47].mxu0  ;;  %2904 = vmatprep.subr.bf16.mxu1 %v3756_v29  ;;  %v3770_v38 = vld [vmem:[%s3927_s12 + $0x10] sm:$0xff]  }
 0x3cb   : > { %v3695_v4 = vpop.eup %3061  ;;  %v1778_v24 = vmul.f32 1.442695, %v1754_v15  ;;  %v1755_v27 = vsub.f32 %v3644_v9, %v1733_v18  ;;  %3071 = vpow2.f32 %v1776_v13  ;;  %v1576_v47 = vmax.f32 %v1544_v7, 0.0  ;;  %2846 = vmatprep.subr.bf16.mxu0 %v1869_v22  ;;  %2912 = vmatpush3.bf16.msra.mxu1 %v3756_v29  ;;  %v3777_v7 = vld [vmem:[%s3927_s12 + $0x18] sm:$0xff]  }
 0x3cc   : > { %v1735_v30 = vpop.xlane.xlu0 %1734  ;;  %1798 = vadd.xlane.f32.xlu0 %v3693_v16  ;;  %1796 = vadd.xlane.f32.xlu1 %v3695_v4  ;;  %v3703_v45 = vpop.eup %3063  ;;  %v1581_v5 = vmax.f32 %v1563_v37, 0.0  ;;  %v1555_v2 = vadd.f32 %v3674_v28, %v1554_v62 }
 0x3cd   : > { %3073 = vpow2.f32 %v1778_v24  ;;  %v1780_v40 = vmul.f32 1.442695, %v1755_v27  ;;  %v1756_v42 = vsub.f32 %v3648_v10, %v1735_v30  ;;  %v3762_v30 = vld [vmem:[%s3927_s12 + $0x8] sm:$0xff]  }
 0x3ce   : > { %v1737_v9 = vpop.xlane.xlu1 %1736  ;;  %2847 = vmatpush3.bf16.msra.mxu0 %v1869_v22  ;;  %v1873_v13 = vpack.c.bf16 %v1581_v5, %v1580_v36  ;;  %v1579_v15 = vmax.f32 %v1555_v2, 0.0  ;;  %2905 = vmatprep.subr.bf16.mxu1 %v3762_v30 }
 0x3cf   : > { %v3706_v53 = vpop.eup %3065  ;;  %v1782_v54 = vmul.f32 1.442695, %v1756_v42  ;;  %v1757_v55 = vsub.f32 %v3652_v14, %v1737_v9  ;;  %3075 = vpow2.f32 %v1780_v40  ;;  %v1871_v14 = vpack.c.bf16 %v1577_v57, %v1576_v47  ;;  %2913 = vmatpush3.bf16.msra.mxu1 %v3762_v30  ;;  %v3791_v40 = vld [vmem:[%s3927_s12 + $0x28] sm:$0xff]   ;;  %v3798_v42 = vld [vmem:[%s3927_s12 + $0x30] sm:$0xff]  }
 0x3d0   : > { %1802 = vadd.xlane.f32.xlu0 %v3706_v53  ;;  %v1739_v10 = vpop.xlane.xlu0 %1738  ;;  %1800 = vadd.xlane.f32.xlu1 %v3703_v45 }
 0x3d1   : > { %3077 = vpow2.f32 %v1782_v54  ;;  %v1784_v61 = vmul.f32 1.442695, %v1757_v55  ;;  %v1758_v11 = vsub.f32 %v3656_v17, %v1739_v10  ;;  %v3713_v12 = vpop.eup %3067  ;;  %v1870_v17 = vpack.c.bf16 %v1575_v26, %v1574_v56  ;;  %2906 = vmatprep.subr.bf16.mxu1 %v3770_v38 }
 0x3d2   : > { %v1741_v25 = vpop.xlane.xlu1 %1740 }
 0x3d3   : > { %v3715_v49 = vpop.eup %3069  ;;  %v1786_v50 = vmul.f32 1.442695, %v1758_v11  ;;  %v1759_v41 = vsub.f32 %v3660_v19, %v1741_v25  ;;  %3079 = vpow2.f32 %v1784_v61  ;;  %2848 = vmatprep.subr.bf16.mxu0 %v1870_v17  ;;  %2914 = vmatpush3.bf16.msra.mxu1 %v3770_v38 }
 0x3d4   : > { %1806 = vadd.xlane.f32.xlu0 %v3715_v49  ;;  %v1743_v46 = vpop.xlane.xlu0 %1742  ;;  %1804 = vadd.xlane.f32.xlu1 %v3713_v12 }
 0x3d5   : > { %3081 = vpow2.f32 %v1786_v50  ;;  %v1788_v31 = vmul.f32 1.442695, %v1759_v41  ;;  %v1760_v32 = vsub.f32 %v3664_v20, %v1743_v46  ;;  %v3723_v19 = vpop.eup %3071  ;;  %2849 = vmatpush3.bf16.msra.mxu0 %v1870_v17  ;;  %v1578_v20 = vmax.f32 %v1552_v33, 0.0  ;;  %2907 = vmatprep.subr.bf16.mxu1 %v3777_v7 }
 0x3d6   : > { %v1745_v35 = vpop.xlane.xlu1 %1744  ;;  %2850 = vmatprep.subr.bf16.mxu0 %v1871_v14 }
 0x3d7   : > { %v3726_v63 = vpop.eup %3073  ;;  %v1790_v1 = vmul.f32 1.442695, %v1760_v32  ;;  %v1761_v3 = vsub.f32 %v3668_v21, %v1745_v35  ;;  %3083 = vpow2.f32 %v1788_v31  ;;  %v1872_v21 = vpack.c.bf16 %v1579_v15, %v1578_v20  ;;  %2915 = vmatpush3.bf16.msra.mxu1 %v3777_v7 }
 0x3d8   : > { %1810 = vadd.xlane.f32.xlu0 %v3726_v63  ;;  %1808 = vadd.xlane.f32.xlu1 %v3723_v19 }
 0x3d9   : > { %3085 = vpow2.f32 %v1790_v1  ;;  %v1792_v6 = vmul.f32 1.442695, %v1761_v3  ;;  %v3732_v8 = vpop.eup %3075  ;;  %2851 = vmatpush3.bf16.msra.mxu0 %v1871_v14  ;;  %2908 = vmatprep.subr.bf16.mxu1 %v3784_v39 }
 0x3da   : > { %2852 = vmatprep.subr.bf16.mxu0 %v1872_v21 }
 0x3db   : > { %v3734_v18 = vpop.eup %3077  ;;  %3087 = vpow2.f32 %v1792_v6  ;;  %2916 = vmatpush3.bf16.msra.mxu1 %v3784_v39 }
 0x3dc   : > { %1814 = vadd.xlane.f32.xlu0 %v3734_v18  ;;  %1812 = vadd.xlane.f32.xlu1 %v3732_v8 }
 0x3dd   : > { %v3738_v22 = vpop.eup %3079  ;;  %2853 = vmatpush3.bf16.msra.mxu0 %v1872_v21  ;;  %2909 = vmatprep.subr.bf16.mxu1 %v3791_v40 }
 0x3de   : > { %2854 = vmatprep.subr.bf16.mxu0 %v1873_v13 }
 0x3df   : > { %v3740_v28 = vpop.eup %3081  ;;  %2917 = vmatpush3.bf16.msra.mxu1 %v3791_v40 }
 0x3e0   : > { %1818 = vadd.xlane.f32.xlu0 %v3740_v28  ;;  %1816 = vadd.xlane.f32.xlu1 %v3738_v22 }
 0x3e1   : > { %v3744_v23 = vpop.eup %3083  ;;  %2855 = vmatpush3.bf16.msra.mxu0 %v1873_v13  ;;  %2910 = vmatprep.subr.bf16.mxu1 %v3798_v42 }
 0x3e2   : > { %2872 = vmatprep.subr.bf16.mxu0 %v3756_v29 }
 0x3e3   : > { %v3746_v24 = vpop.eup %3085  ;;  %2918 = vmatpush3.bf16.msra.mxu1 %v3798_v42 }
 0x3e4   : > { %1822 = vadd.xlane.f32.xlu0 %v3746_v24  ;;  %1820 = vadd.xlane.f32.xlu1 %v3744_v23 }
 0x3e5   : > { %v3750_v27 = vpop.eup %3087 }
 0x3e8   : > { %1824 = vadd.xlane.f32.xlu1 %v3750_v27 }
 0x455   : > { %v1795_v43 = vpop.xlane.xlu0 %1794 }
 0x456   : > { %3089 = vrcp.f32 %v1795_v43 }
 0x459   : > { %v1799_v44 = vpop.xlane.xlu0 %1798  ;;  %v1797_v9 = vpop.xlane.xlu1 %1796 }
 0x45a   : > { %3091 = vrcp.f32 %v1797_v9 }
 0x45b   : > { %3093 = vrcp.f32 %v1799_v44 }
 0x45d   : > { %v1803_v47 = vpop.xlane.xlu0 %1802  ;;  %v1801_v51 = vpop.xlane.xlu1 %1800 }
 0x45e   : > { %3095 = vrcp.f32 %v1801_v51 }
 0x45f   : > { %3097 = vrcp.f32 %v1803_v47 }
 0x460   : > { %v3090_v55 = vpop.eup %3089 }
 0x461   : > { %v1807_v52 = vpop.xlane.xlu0 %1806  ;;  %v1805_v54 = vpop.xlane.xlu1 %1804  ;;  %v1842_v48 = vmul.f32 %v3090_v55, %v3687_v0 }
 0x462   : > { %3099 = vrcp.f32 %v1805_v54 }
 0x463   : > { %3101 = vrcp.f32 %v1807_v52 }
 0x464   : > { %v3092_v10 = vpop.eup %3091 }
 0x465   : > { %v1811_v56 = vpop.xlane.xlu0 %1810  ;;  %v1809_v57 = vpop.xlane.xlu1 %1808  ;;  %v1843_v61 = vmul.f32 %v3092_v10, %v3695_v4 }
 0x466   : > { %v3094_v11 = vpop.eup %3093  ;;  %3103 = vrcp.f32 %v1809_v57 }
 0x467   : > { %v1858_v25 = vpack.c.bf16 %v1843_v61, %v1842_v48  ;;  %3105 = vrcp.f32 %v1811_v56  ;;  %v1844_v41 = vmul.f32 %v3094_v11, %v3693_v16 }
 0x468   : > { %v3096_v14 = vpop.eup %3095 }
 0x469   : > { %v1815_v26 = vpop.xlane.xlu0 %1814  ;;  %v1813_v50 = vpop.xlane.xlu1 %1812  ;;  %v1845_v58 = vmul.f32 %v3096_v14, %v3703_v45  ;;  %2856 = vmatprep.mubr.bf16.mxu0 %v1858_v25 }
 0x46a   : > { %v3098_v46 = vpop.eup %3097  ;;  %3107 = vrcp.f32 %v1813_v50  ;;  %v2425_v50 = vld [vmem:[%s3928_s13] ss:$0 sm:$0xff] }
 0x46b   : > { %v1859_v17 = vpack.c.bf16 %v1845_v58, %v1844_v41  ;;  %3109 = vrcp.f32 %v1815_v26  ;;  %v1846_v4 = vmul.f32 %v3098_v46, %v3706_v53 }
 0x46c   : > { %v3100_v59 = vpop.eup %3099 }
 0x46d   : > { %v1819_v0 = vpop.xlane.xlu0 %1818  ;;  %v1817_v60 = vpop.xlane.xlu1 %1816  ;;  %2857 = vmatmul.mubr.bf16.vlgmr.msra.gmra.mrb[48].mxu0 %v1859_v17  ;;  %v1847_v31 = vmul.f32 %v3100_v59, %v3713_v12 }
 0x46e   : > { %v3102_v32 = vpop.eup %3101  ;;  %3111 = vrcp.f32 %v1817_v60  ;;  %2873 = vmatpush3.bf16.msra.mxu0 %v3756_v29 }
 0x46f   : > { %v1860_v16 = vpack.c.bf16 %v1847_v31, %v1846_v4  ;;  %2874 = vmatprep.subr.bf16.mxu0 %v3762_v30  ;;  %3113 = vrcp.f32 %v1819_v0  ;;  %v1848_v35 = vmul.f32 %v3102_v32, %v3715_v49 }
 0x470   : > { %v3104_v45 = vpop.eup %3103 }
 0x471   : > { %v1823_v33 = vpop.xlane.xlu0 %1822  ;;  %v1821_v34 = vpop.xlane.xlu1 %1820  ;;  %2860 = vmatprep.mubr.bf16.mxu0 %v1860_v16  ;;  %v1849_v36 = vmul.f32 %v3104_v45, %v3723_v19 }
 0x472   : > { %v3106_v37 = vpop.eup %3105  ;;  %3115 = vrcp.f32 %v1821_v34  ;;  %2875 = vmatpush3.bf16.msra.mxu0 %v3762_v30 }
 0x473   : > { %3117 = vrcp.f32 %v1823_v33  ;;  %v1861_v53 = vpack.c.bf16 %v1849_v36, %v1848_v35  ;;  %2876 = vmatprep.subr.bf16.mxu0 %v3770_v38  ;;  %v1850_v1 = vmul.f32 %v3106_v37, %v3726_v63 }
 0x474   : > { %v3108_v12 = vpop.eup %3107 }
 0x475   : > { %v1825_v62 = vpop.xlane.xlu1 %1824  ;;  %2861 = vmatmul.mubr.bf16.gmra.mrb[52].mxu0 %v1861_v53  ;;  %v1851_v3 = vmul.f32 %v3108_v12, %v3732_v8  ;;  %v3110_v20 = vpop.eup %3109 }
 0x476   : > { %3119 = vrcp.f32 %v1825_v62  ;;  %2877 = vmatpush3.bf16.msra.mxu0 %v3770_v38  ;;  %v1852_v5 = vmul.f32 %v3110_v20, %v3734_v18 }
 0x477   : > { %v1862_v49 = vpack.c.bf16 %v1851_v3, %v1850_v1  ;;  %2878 = vmatprep.subr.bf16.mxu0 %v3777_v7 }
 0x478   : > { %v3112_v19 = vpop.eup %3111 }
 0x479   : > { %2864 = vmatprep.mubr.bf16.mxu0 %v1862_v49  ;;  %v1853_v2 = vmul.f32 %v3112_v19, %v3738_v22  ;;  %v3114_v6 = vpop.eup %3113 }
 0x47a   : > { %2879 = vmatpush3.bf16.msra.mxu0 %v3777_v7  ;;  %v1854_v15 = vmul.f32 %v3114_v6, %v3740_v28  ;;  %v3056_v28 = vld [vmem:[%s3927_s12 + $0x38] sm:$0xff]  }
 0x47b   : > { %v1863_v13 = vpack.c.bf16 %v1853_v2, %v1852_v5  ;;  %2880 = vmatprep.subr.bf16.mxu0 %v3784_v39  ;;  %2911 = vmatprep.subr.bf16.mxu1 %v3056_v28 }
 0x47c   : > { %v3116_v63 = vpop.eup %3115  ;;  %2919 = vmatpush3.bf16.msra.mxu1 %v3056_v28 }
 0x47d   : > { %v3118_v8 = vpop.eup %3117  ;;  %2865 = vmatmul.mubr.bf16.gmra.mrb[56].mxu0 %v1863_v13  ;;  %v1855_v21 = vmul.f32 %v3116_v63, %v3744_v23 }
 0x47e   : > { %2881 = vmatpush3.bf16.msra.mxu0 %v3784_v39  ;;  %v1856_v18 = vmul.f32 %v3118_v8, %v3746_v24 }
 0x47f   : > { %v1864_v30 = vpack.c.bf16 %v1855_v21, %v1854_v15  ;;  %2882 = vmatprep.subr.bf16.mxu0 %v3791_v40 }
 0x480   : > { %v3120_v29 = vpop.eup %3119 }
 0x481   : > { %v1857_v22 = vmul.f32 %v3120_v29, %v3750_v27  ;;  %2868 = vmatprep.mubr.bf16.mxu0 %v1864_v30 }
 0x482   : > { %2883 = vmatpush3.bf16.msra.mxu0 %v3791_v40 }
 0x483   : > { %v1865_v38 = vpack.c.bf16 %v1857_v22, %v1856_v18  ;;  %2884 = vmatprep.subr.bf16.mxu0 %v3798_v42 }
 0x485   : > { %2869 = vmatmul.mubr.bf16.gmra.mrb[60].mxu0 %v1865_v38 }
 0x486   : > { %2885 = vmatpush3.bf16.msra.mxu0 %v3798_v42 }
 0x487   : > { %2886 = vmatprep.subr.bf16.mxu0 %v3056_v28 }
 0x48a   : > { %2887 = vmatpush3.bf16.msra.mxu0 %v3056_v28 }
 0x540   : > { %v2858_v23 = vpop.f32.mrb[48].mxu0 }
 0x541   : > { %v1908_v24 = vpop.f32.mrb[49].mxu0 }
 0x542   : > { %v2859_v27 = vpop.f32.mrb[50].mxu0 }
 0x543   : > { %v1972_v7 = vpack.c.bf16 %v2859_v27, %v2858_v23  ;;  %v1911_v39 = vpop.f32.mrb[51].mxu0 }
 0x544   : > { %v1971_v43 = vpack.c.bf16 %v1911_v39, %v1908_v24 }
 0x546   : > { %2888 = vmatprep.mubr.bf16.mxu0 %v1971_v43 }
 0x547   : > { %2889 = vmatmul.mubr.bf16.vlgmr.msra.gmra.mrb[64].mxu0 %v1972_v7 }
 0x548   : > { %v2862_v40 = vpop.f32.mrb[52].mxu0 }
 0x549   : > { %v1924_v44 = vpop.f32.mrb[53].mxu0 }
 0x54a   : > { %v2863_v9 = vpop.f32.mrb[54].mxu0 }
 0x54b   : > { %v1974_v42 = vpack.c.bf16 %v2863_v9, %v2862_v40  ;;  %v1927_v47 = vpop.f32.mrb[55].mxu0 }
 0x54c   : > { %v1973_v51 = vpack.c.bf16 %v1927_v47, %v1924_v44 }
 0x54e   : > { %2892 = vmatprep.mubr.bf16.mxu0 %v1973_v51 }
 0x54f   : > { %2893 = vmatmul.mubr.bf16.gmra.mrb[68].mxu0 %v1974_v42 }
 0x550   : > { %v2866_v52 = vpop.f32.mrb[56].mxu0 }
 0x551   : > { %v1940_v54 = vpop.f32.mrb[57].mxu0 }
 0x552   : > { %v2867_v55 = vpop.f32.mrb[58].mxu0 }
 0x553   : > { %v1976_v10 = vpack.c.bf16 %v2867_v55, %v2866_v52  ;;  %v1943_v56 = vpop.f32.mrb[59].mxu0 }
 0x554   : > { %v1975_v57 = vpack.c.bf16 %v1943_v56, %v1940_v54 }
 0x556   : > { %2896 = vmatprep.mubr.bf16.mxu1 %v1975_v57 }
 0x557   : > { %2897 = vmatmul.mubr.bf16.vlgmr.msra.gmra.mrb[48].mxu1 %v1976_v10 }
 0x558   : > { %v2870_v48 = vpop.f32.mrb[60].mxu0 }
 0x559   : > { %v1956_v61 = vpop.f32.mrb[61].mxu0 }
 0x55a   : > { %v2871_v11 = vpop.f32.mrb[62].mxu0 }
 0x55b   : > { %v1978_v25 = vpack.c.bf16 %v2871_v11, %v2870_v48  ;;  %v1959_v14 = vpop.f32.mrb[63].mxu0 }
 0x55c   : > { %v1977_v26 = vpack.c.bf16 %v1959_v14, %v1956_v61 }
 0x55e   : > { %2900 = vmatprep.mubr.bf16.mxu1 %v1977_v26 }
 0x55f   : > { %2901 = vmatmul.mubr.bf16.gmra.mrb[52].mxu1 %v1978_v25 }
 0x61a   : > { %v2890_v41 = vpop.f32.mrb[64].mxu0 }
 0x61b   : > { %v2093_v58 = vadd.f32 %v2890_v41, %v2425_v50  ;;  %v2084_v46 = vpop.f32.mrb[65].mxu0 }
 0x61c   : > { %v2085_v17 = vadd.f32 %v2425_v50, %v2084_v46  ;;  %v2891_v59 = vpop.f32.mrb[66].mxu0 }
 0x61d   : > { %v2096_v0 = vadd.f32 %v2891_v59, %v2425_v50  ;;  %v2087_v60 = vpop.f32.mrb[67].mxu0  ;;  %v2149_v31 = vmax.f32 %v2093_v58, 0.0 }
 0x61e   : > { %v2088_v4 = vadd.f32 %v2425_v50, %v2087_v60  ;;  %v2147_v16 = vmax.f32 %v2085_v17, 0.0 }
 0x61f   : > { %v2150_v32 = vmax.f32 %v2096_v0, 0.0 }
 0x620   : > { %v2148_v45 = vmax.f32 %v2088_v4, 0.0 }
 0x621   : > { %v2481_v33 = vpack.c.bf16 %v2150_v32, %v2149_v31 }
 0x622   : > { %v2476_v34 = vpack.c.bf16 %v2148_v45, %v2147_v16  ;;  %v2894_v35 = vpop.f32.mrb[68].mxu0 }
 0x623   : > { %2513 = vst [vmem:[%s3841_s27 + $0x8] sm:$0xff] %v2481_v33   ;;  %v2109_v36 = vadd.f32 %v2894_v35, %v2425_v50  ;;  %v2100_v37 = vpop.f32.mrb[69].mxu0 }
 0x624   : > { %2477 = vst [vmem:[%s3841_s27] sm:$0xff] %v2476_v34   ;;  %v2101_v53 = vadd.f32 %v2425_v50, %v2100_v37  ;;  %v2895_v12 = vpop.f32.mrb[70].mxu0 }
 0x625   : > { %v2112_v62 = vadd.f32 %v2895_v12, %v2425_v50  ;;  %v2103_v1 = vpop.f32.mrb[71].mxu0  ;;  %v2153_v20 = vmax.f32 %v2109_v36, 0.0 }
 0x626   : > { %v2104_v3 = vadd.f32 %v2425_v50, %v2103_v1  ;;  %v2151_v19 = vmax.f32 %v2101_v53, 0.0 }
 0x627   : > { %v2154_v49 = vmax.f32 %v2112_v62, 0.0 }
 0x628   : > { %v2152_v5 = vmax.f32 %v2104_v3, 0.0 }
 0x629   : > { %v2491_v2 = vpack.c.bf16 %v2154_v49, %v2153_v20 }
 0x62a   : > { %v2486_v6 = vpack.c.bf16 %v2152_v5, %v2151_v19  ;;  %v2898_v13 = vpop.f32.mrb[48].mxu1 }
 0x62b   : > { %2515 = vst [vmem:[%s3841_s27 + $0x18] sm:$0xff] %v2491_v2   ;;  %v2125_v63 = vadd.f32 %v2898_v13, %v2425_v50  ;;  %v2116_v8 = vpop.f32.mrb[49].mxu1 }
 0x62c   : > { %2514 = vst [vmem:[%s3841_s27 + $0x10] sm:$0xff] %v2486_v6   ;;  %v2117_v15 = vadd.f32 %v2425_v50, %v2116_v8  ;;  %v2899_v21 = vpop.f32.mrb[50].mxu1 }
 0x62d   : > { %v2128_v29 = vadd.f32 %v2899_v21, %v2425_v50  ;;  %v2119_v30 = vpop.f32.mrb[51].mxu1  ;;  %v2157_v22 = vmax.f32 %v2125_v63, 0.0 }
 0x62e   : > { %v2120_v18 = vadd.f32 %v2425_v50, %v2119_v30  ;;  %v2155_v28 = vmax.f32 %v2117_v15, 0.0 }
 0x62f   : > { %v2158_v38 = vmax.f32 %v2128_v29, 0.0 }
 0x630   : > { %v2156_v23 = vmax.f32 %v2120_v18, 0.0 }
 0x631   : > { %v2501_v24 = vpack.c.bf16 %v2158_v38, %v2157_v22 }
 0x632   : > { %v2496_v27 = vpack.c.bf16 %v2156_v23, %v2155_v28  ;;  %v2902_v7 = vpop.f32.mrb[52].mxu1 }
 0x633   : > { %2517 = vst [vmem:[%s3841_s27 + $0x28] sm:$0xff] %v2501_v24   ;;  %v2141_v39 = vadd.f32 %v2902_v7, %v2425_v50  ;;  %v2132_v43 = vpop.f32.mrb[53].mxu1 }
 0x634   : > { %2516 = vst [vmem:[%s3841_s27 + $0x20] sm:$0xff] %v2496_v27   ;;  %v2133_v40 = vadd.f32 %v2425_v50, %v2132_v43  ;;  %v2903_v44 = vpop.f32.mrb[54].mxu1 }
 0x635   : > { %v2144_v9 = vadd.f32 %v2903_v44, %v2425_v50  ;;  %v2135_v42 = vpop.f32.mrb[55].mxu1  ;;  %v2161_v51 = vmax.f32 %v2141_v39, 0.0 }
 0x636   : > { %v2136_v47 = vadd.f32 %v2425_v50, %v2135_v42  ;;  %v2159_v54 = vmax.f32 %v2133_v40, 0.0 }
 0x637   : > { %v2162_v52 = vmax.f32 %v2144_v9, 0.0 }
 0x638   : > { %v2160_v55 = vmax.f32 %v2136_v47, 0.0 }
 0x639   : > { %v2511_v10 = vpack.c.bf16 %v2162_v52, %v2161_v51 }
 0x63a   : > { %v2506_v56 = vpack.c.bf16 %v2160_v55, %v2159_v54 }
 0x63b   : > { %2519 = vst [vmem:[%s3841_s27 + $0x38] sm:$0xff] %v2511_v10  }
 0x63c   : > { %2518 = vst [vmem:[%s3841_s27 + $0x30] sm:$0xff] %v2506_v56  }
 0x63d   : > { %3134 = shalt.err (!%p3131_p7)
}
 0x63e   : > { %s3135_s28 = scalar_lea.hbm %s3855_s25, 1024  ;;  %s3139_s17 = scalar_lea.hbm %s3951_s22, 4096 }
 0x63f   : > { %p3136_p9 = scmp.ne.s32.totalorder %s3855_s25, %s3135_s28  ;;  %p3140_p12 = scmp.lt.u32.totalorder %s3855_s25, %s3951_s22 }
 0x640   : > { %p3141_p13 = scmp.lt.u32.totalorder %s3139_s17, %s3135_s28  ;;  %p3143_p1 = scmp.lt.u32.totalorder %s3135_s28, %s3855_s25 }
 0x641   : > { %p3137_p10 = pnand %p3136_p9, %p3346_p3 }
 0x642   : > { %p3142_p0 = por %p3141_p13, %p3140_p12 }
 0x643   : > { %p3138_p11 = pneg %p3137_p10 }
 0x644   : > { %p3144_p2 = por %p3143_p1, %p3142_p0 }
 0x646   : > { %p3145_p4 = pnand %p3144_p2, %p3138_p11 }
 0x648   : > { %3148 = shalt.err (!%p3145_p4)
}
 0x649   : > { %s3218_s18 = smov 64   ;;  %s3219_s19 = smov 4  }
 0x64a   : > { %2920 = dma.vmem_to_hbm [thread:$0]  (%p3346_p3), %s3857_s26, 1024, %s3855_s25, %s3863_s29, %s3218_s18, %s3218_s18, %s3219_s19  }
 0x64b PF: > { %s3952_s24 = sld [smem:[#allocation5_spill]]  ;;  %p2926_p5 = scmp.ge.s32.totalorder %s3215_s20, 2 }
 0x64d   : > { %p2923_p6 = pnand %p2926_p5, %p3355_p8 }
 0x651   : > { %s2274_s21 = sand.u32 1, %s3952_s24  }
 0x652   : > { %s2275_s28 = scalar_lea.sflag [#allocation3], %s2274_s21 }
 0x653   : > { %3182 = dma.done.wait (!%p2923_p6), %s2275_s28, 1024  }
 0x654   : > { %3184 = vsyncadd (!%p2923_p6), %s2275_s28, 4294966272  ;;  %s27_s20 = sadd.s32 1, %s3215_s20   ;;  %s3954_s17 = sld [smem:[#allocation12_spill]] }
 0x655   : > { %p24_p7 = scmp.ge.s32.totalorder %s27_s20, 6   ;;  %s3955_s16 = sld [smem:[#allocation6_spill]] }
 0x656   : > { %s3956_s23 = sld [smem:[#allocation7_spill]]  ;;  %s3957_s18 = sld [smem:[#allocation8_spill]] }
 0x657   : > { %s3958_s19 = sld [smem:[#allocation10_spill]]  ;;  %s3959_s29 = smov %s3191_s30 }
 0x658   : > { %s3960_s30 = smov %s3195_s15  ;;  %26 = sbr.rel (!%p24_p7) target bundleno = 7 (0x7), region = 114 }
 0x65a   : > { %s3961_s15 = smov %s3954_s17 }
 0x65c   : > { %s3962_s17 = smov %s3956_s23 }
 0x65f   :  { %2280 = vsyncpa [#allocation3], 1 }
 0x660   :  { %2282 = vsyncpa [#allocation3 + $0x1], 1 }

</bundles_post_ra>
